<compile_context>
chip_gen: v7x
topology: tpu7x:2x2x1
jax: 0.10.0
libtpu: 0.0.40
codegen_flags: <defaults>
</compile_context>

<pallas_src>
import jax
import jax.numpy as jnp
from jax.experimental import pallas as pl
from jax.experimental.pallas import tpu as pltpu

IN_DIM = 16000
H1 = 128
H2 = 64
N_LABELS = 35

TK = 3200                      # 128-aligned divisor of 16000 -> 5 K-steps
MAX_TB = 256                   # batch tile cap


def simplenet_kernel(x_ref, w1_ref, b1_ref, w2_ref, b2_ref, w3_ref, b3_ref,
                     o_ref, acc_ref):
    k = pl.program_id(1)

    # ---- init f32 accumulator on first K step ----
    @pl.when(k == 0)
    def _():
        acc_ref[...] = jnp.zeros_like(acc_ref)

    # ---- Linear(16000, 128): partial contraction over this K chunk (MXU, bf16 in / f32 acc) ----
    acc_ref[...] += jnp.dot(
        x_ref[...].astype(jnp.bfloat16),
        w1_ref[...],
        preferred_element_type=jnp.float32,
    )

    # ---- epilogue only on last K step: bias+ReLU, L2, L3, log_softmax ----
    @pl.when(k == pl.num_programs(1) - 1)
    def _():
        h1 = jnp.maximum(acc_ref[...] + b1_ref[...], 0.0)

        h2 = jnp.dot(h1, w2_ref[...], preferred_element_type=jnp.float32)
        h2 = jnp.maximum(h2 + b2_ref[...], 0.0)

        logits = jnp.dot(h2, w3_ref[...], preferred_element_type=jnp.float32) + b3_ref[...]

        m = jnp.max(logits, axis=-1, keepdims=True)
        shifted = logits - m
        lse = jnp.log(jnp.sum(jnp.exp(shifted), axis=-1, keepdims=True))
        o_ref[...] = (shifted - lse).astype(o_ref.dtype)


def simplenet_forward(x, w1, b1, w2, b2, w3, b3):
    B = x.shape[0]

    # W1 is the dominant HBM stream; keep it bf16 (pre-cast once offline in real use).
    if w1.dtype != jnp.bfloat16:
        w1 = w1.astype(jnp.bfloat16)

    # Batch tiling: tb up to MAX_TB, pad B so the grid covers all rows.
    tb = B if B <= MAX_TB else MAX_TB
    n_b = -(-B // tb)                    # ceil div
    Bp = n_b * tb
    if Bp != B:
        x = jnp.pad(x, ((0, Bp - B), (0, 0)))

    n_k = IN_DIM // TK

    grid_spec = pltpu.PrefetchScalarGridSpec(
        num_scalar_prefetch=0,
        grid=(n_b, n_k),                                       # (batch, K-reduction)
        in_specs=[
            pl.BlockSpec((tb, TK), lambda i, k: (i, k)),       # x chunk
            pl.BlockSpec((TK, H1), lambda i, k: (k, 0)),       # W1 chunk (bf16)
            pl.BlockSpec((1, H1), lambda i, k: (0, 0)),        # b1
            pl.BlockSpec((H1, H2), lambda i, k: (0, 0)),       # W2
            pl.BlockSpec((1, H2), lambda i, k: (0, 0)),        # b2
            pl.BlockSpec((H2, N_LABELS), lambda i, k: (0, 0)), # W3
            pl.BlockSpec((1, N_LABELS), lambda i, k: (0, 0)),  # b3
        ],
        out_specs=pl.BlockSpec((tb, N_LABELS), lambda i, k: (i, 0)),
        scratch_shapes=[pltpu.VMEM((tb, H1), jnp.float32)],    # layer-1 accumulator
    )

    out = pl.pallas_call(
        simplenet_kernel,
        out_shape=jax.ShapeDtypeStruct((Bp, N_LABELS), jnp.float32),
        grid_spec=grid_spec,
        compiler_params=pltpu.CompilerParams(
            # batch axis parallel (megacore), reduction axis arbitrary and last.
            dimension_semantics=("parallel", "arbitrary"),
        ),
    )(x, w1, b1, w2, b2, w3, b3)

    return out[:B]


def init_params(key):
    """Deterministic init matching nn.Linear default: U(-1/sqrt(fan_in), 1/sqrt(fan_in))."""
    ks = jax.random.split(key, 6)

    def lin(kw, kb, fan_in, fan_out):
        bound = 1.0 / jnp.sqrt(fan_in)
        w = jax.random.uniform(kw, (fan_in, fan_out), jnp.float32, -bound, bound)
        b = jax.random.uniform(kb, (1, fan_out), jnp.float32, -bound, bound)
        return w, b

    w1, b1 = lin(ks[0], ks[1], IN_DIM, H1)
    w2, b2 = lin(ks[2], ks[3], H1, H2)
    w3, b3 = lin(ks[4], ks[5], H2, N_LABELS)
    # Pre-cast the big first-layer weight to bf16 once (HBM-bandwidth dominant term).
    w1 = w1.astype(jnp.bfloat16)
    return w1, b1, w2, b2, w3, b3


if __name__ == "__main__":
    key = jax.random.PRNGKey(0)
    k_x, k_p = jax.random.split(key)

    B = 8  # small batch
    x = jax.random.normal(k_x, (B, IN_DIM), dtype=jnp.float32)
    params = init_params(k_p)

    out = simplenet_forward(x, *params)
    out = jax.block_until_ready(out)

    # sanity: log_softmax rows should (approximately) exp-sum to 1
    row_sums = jnp.sum(jnp.exp(out), axis=-1)
    assert out.shape == (B, N_LABELS)
    assert bool(jnp.allclose(row_sums, 1.0, atol=1e-4))

    # cross-check against a pure-JAX reference (same bf16 W1 path)
    def ref(x, w1, b1, w2, b2, w3, b3):
        h1 = jnp.maximum(x.astype(jnp.bfloat16) @ w1 + b1, 0.0).astype(jnp.float32)
        h2 = jnp.maximum(h1 @ w2 + b2, 0.0)
        logits = h2 @ w3 + b3
        return jax.nn.log_softmax(logits, axis=-1)

    ref_out = ref(x, *params)
    assert bool(jnp.allclose(out, ref_out, atol=2e-2, rtol=2e-2))

    print("KERNEL_OK")
</pallas_src>

<mosaic_0001>
module attributes {stable_mosaic.version = 11 : i64} {
  func.func @simplenet_kernel(%arg0: i32, %arg1: i32, %arg2: memref<8x3200xf32, #tpu.memory_space<vmem>>, %arg3: memref<3200x128xbf16, #tpu.memory_space<vmem>>, %arg4: memref<1x128xf32, #tpu.memory_space<vmem>>, %arg5: memref<128x64xf32, #tpu.memory_space<vmem>>, %arg6: memref<1x64xf32, #tpu.memory_space<vmem>>, %arg7: memref<64x35xf32, #tpu.memory_space<vmem>>, %arg8: memref<1x35xf32, #tpu.memory_space<vmem>>, %arg9: memref<8x35xf32, #tpu.memory_space<vmem>>, %arg10: memref<8x128xf32, #tpu.memory_space<vmem>>) attributes {dimension_semantics = [#tpu.dimension_semantics<parallel>, #tpu.dimension_semantics<arbitrary>], iteration_bounds = array<i64: 1, 5>, scalar_prefetch = 0 : i64, scratch_operands = 1 : i64, tpu.core_type = #tpu.core_type<tc>, window_params = [{transform_indices = @transform_0, window_bounds = array<i64: 8, 3200>}, {transform_indices = @transform_1, window_bounds = array<i64: 3200, 128>}, {pipeline_mode = #tpu.pipeline_mode<synchronous>, transform_indices = @transform_2, window_bounds = array<i64: 1, 128>}, {pipeline_mode = #tpu.pipeline_mode<synchronous>, transform_indices = @transform_3, window_bounds = array<i64: 128, 64>}, {pipeline_mode = #tpu.pipeline_mode<synchronous>, transform_indices = @transform_4, window_bounds = array<i64: 1, 64>}, {pipeline_mode = #tpu.pipeline_mode<synchronous>, transform_indices = @transform_5, window_bounds = array<i64: 64, 35>}, {pipeline_mode = #tpu.pipeline_mode<synchronous>, transform_indices = @transform_6, window_bounds = array<i64: 1, 35>}, {transform_indices = @transform_7, window_bounds = array<i64: 8, 35>}]} {
    %c0_i32 = arith.constant 0 : i32
    %0 = arith.cmpi eq, %arg1, %c0_i32 : i32
    %1 = arith.extui %0 : i1 to i32
    %c0_i32_0 = arith.constant 0 : i32
    %2 = arith.cmpi ne, %1, %c0_i32_0 : i32
    scf.if %2 {
      %cst_9 = arith.constant 0.000000e+00 : f32
      %13 = vector.broadcast %cst_9 : f32 to vector<8x128xf32>
      %c0_10 = arith.constant 0 : index
      %c0_11 = arith.constant 0 : index
      %14 = vector.load %arg10[%c0_10, %c0_11] : memref<8x128xf32, #tpu.memory_space<vmem>>, vector<8x128xf32>
      tpu.vector_store %arg10[%c0_10, %c0_11], %13 {strides = array<i32>} : memref<8x128xf32, #tpu.memory_space<vmem>>, vector<8x128xf32>,
    } else {
    }
    %c0 = arith.constant 0 : index
    %c0_1 = arith.constant 0 : index
    %3 = vector.load %arg10[%c0, %c0_1] : memref<8x128xf32, #tpu.memory_space<vmem>>, vector<8x128xf32>
    %c0_2 = arith.constant 0 : index
    %c0_3 = arith.constant 0 : index
    %4 = vector.load %arg2[%c0_2, %c0_3] : memref<8x3200xf32, #tpu.memory_space<vmem>>, vector<8x3200xf32>
    %5 = arith.truncf %4 : vector<8x3200xf32> to vector<8x3200xbf16>
    %c0_4 = arith.constant 0 : index
    %c0_5 = arith.constant 0 : index
    %6 = vector.load %arg3[%c0_4, %c0_5] : memref<3200x128xbf16, #tpu.memory_space<vmem>>, vector<3200x128xbf16>
    %cst = arith.constant dense<0.000000e+00> : vector<8x128xf32>
    %7 = tpu.matmul %5, %6, %cst {dimension_numbers = #tpu.dot_dimension_numbers<[1], [0], [0], [1], [0, 0, 1, 1], [], []>} : vector<8x3200xbf16>, vector<3200x128xbf16>, vector<8x128xf32> -> vector<8x128xf32>
    %8 = arith.addf %3, %7 : vector<8x128xf32>
    %c0_6 = arith.constant 0 : index
    %c0_7 = arith.constant 0 : index
    %9 = vector.load %arg10[%c0_6, %c0_7] : memref<8x128xf32, #tpu.memory_space<vmem>>, vector<8x128xf32>
    tpu.vector_store %arg10[%c0_6, %c0_7], %8 {strides = array<i32>} : memref<8x128xf32, #tpu.memory_space<vmem>>, vector<8x128xf32>,
    %c4_i32 = arith.constant 4 : i32
    %10 = arith.cmpi eq, %arg1, %c4_i32 : i32
    %11 = arith.extui %10 : i1 to i32
    %c0_i32_8 = arith.constant 0 : i32
    %12 = arith.cmpi ne, %11, %c0_i32_8 : i32
    scf.if %12 {
      %c0_9 = arith.constant 0 : index
      %c0_10 = arith.constant 0 : index
      %13 = vector.load %arg10[%c0_9, %c0_10] : memref<8x128xf32, #tpu.memory_space<vmem>>, vector<8x128xf32>
      %c0_11 = arith.constant 0 : index
      %c0_12 = arith.constant 0 : index
      %14 = vector.load %arg4[%c0_11, %c0_12] : memref<1x128xf32, #tpu.memory_space<vmem>>, vector<1x128xf32>
      %15 = vector.broadcast %14 : vector<1x128xf32> to vector<8x128xf32>
      %16 = arith.addf %13, %15 : vector<8x128xf32>
      %cst_13 = arith.constant 0.000000e+00 : f32
      %17 = vector.broadcast %cst_13 : f32 to vector<8x128xf32>
      %18 = arith.maximumf %16, %17 : vector<8x128xf32>
      %c0_14 = arith.constant 0 : index
      %c0_15 = arith.constant 0 : index
      %19 = vector.load %arg5[%c0_14, %c0_15] : memref<128x64xf32, #tpu.memory_space<vmem>>, vector<128x64xf32>
      %cst_16 = arith.constant dense<0.000000e+00> : vector<8x64xf32>
      %20 = tpu.matmul %18, %19, %cst_16 {dimension_numbers = #tpu.dot_dimension_numbers<[1], [0], [0], [1], [0, 0, 1, 1], [], []>} : vector<8x128xf32>, vector<128x64xf32>, vector<8x64xf32> -> vector<8x64xf32>
      %c0_17 = arith.constant 0 : index
      %c0_18 = arith.constant 0 : index
      %21 = vector.load %arg6[%c0_17, %c0_18] : memref<1x64xf32, #tpu.memory_space<vmem>>, vector<1x64xf32>
      %22 = vector.broadcast %21 : vector<1x64xf32> to vector<8x64xf32>
      %23 = arith.addf %20, %22 : vector<8x64xf32>
      %cst_19 = arith.constant 0.000000e+00 : f32
      %24 = vector.broadcast %cst_19 : f32 to vector<8x64xf32>
      %25 = arith.maximumf %23, %24 : vector<8x64xf32>
      %c0_20 = arith.constant 0 : index
      %c0_21 = arith.constant 0 : index
      %26 = vector.load %arg7[%c0_20, %c0_21] : memref<64x35xf32, #tpu.memory_space<vmem>>, vector<64x35xf32>
      %cst_22 = arith.constant dense<0.000000e+00> : vector<8x35xf32>
      %27 = tpu.matmul %25, %26, %cst_22 {dimension_numbers = #tpu.dot_dimension_numbers<[1], [0], [0], [1], [0, 0, 1, 1], [], []>} : vector<8x64xf32>, vector<64x35xf32>, vector<8x35xf32> -> vector<8x35xf32>
      %c0_23 = arith.constant 0 : index
      %c0_24 = arith.constant 0 : index
      %28 = vector.load %arg8[%c0_23, %c0_24] : memref<1x35xf32, #tpu.memory_space<vmem>>, vector<1x35xf32>
      %29 = vector.broadcast %28 : vector<1x35xf32> to vector<8x35xf32>
      %30 = arith.addf %27, %29 : vector<8x35xf32>
      %cst_25 = arith.constant dense<0xFF800000> : vector<8xf32>
      %31 = vector.multi_reduction <maximumf>, %30, %cst_25 [1] : vector<8x35xf32> to vector<8xf32>
      %32 = vector.shape_cast %31 : vector<8xf32> to vector<8x1xf32>
      %33 = vector.broadcast %32 : vector<8x1xf32> to vector<8x35xf32>
      %34 = arith.subf %30, %33 : vector<8x35xf32>
      %35 = math.exp %34 : vector<8x35xf32>
      %cst_26 = arith.constant dense<0.000000e+00> : vector<8xf32>
      %36 = vector.multi_reduction <add>, %35, %cst_26 [1] : vector<8x35xf32> to vector<8xf32>
      %37 = vector.shape_cast %36 : vector<8xf32> to vector<8x1xf32>
      %38 = math.log %37 : vector<8x1xf32>
      %39 = vector.broadcast %38 : vector<8x1xf32> to vector<8x35xf32>
      %40 = arith.subf %34, %39 : vector<8x35xf32>
      %c0_27 = arith.constant 0 : index
      %c0_28 = arith.constant 0 : index
      %41 = vector.load %arg9[%c0_27, %c0_28] : memref<8x35xf32, #tpu.memory_space<vmem>>, vector<8x35xf32>
      tpu.vector_store %arg9[%c0_27, %c0_28], %40 {strides = array<i32>} : memref<8x35xf32, #tpu.memory_space<vmem>>, vector<8x35xf32>,
    } else {
    }
    return
  }
  func.func @transform_0(%arg0: i32, %arg1: i32) -> (i32, i32) {
    %c0_i32 = arith.constant 0 : i32
    return %arg0, %arg1 : i32, i32
  }
  func.func @transform_1(%arg0: i32, %arg1: i32) -> (i32, i32) {
    %c0_i32 = arith.constant 0 : i32
    %c0_i32_0 = arith.constant 0 : i32
    return %arg1, %c0_i32 : i32, i32
  }
  func.func @transform_2(%arg0: i32, %arg1: i32) -> (i32, i32) {
    %c0_i32 = arith.constant 0 : i32
    %c0_i32_0 = arith.constant 0 : i32
    %c0_i32_1 = arith.constant 0 : i32
    return %c0_i32, %c0_i32_0 : i32, i32
  }
  func.func @transform_3(%arg0: i32, %arg1: i32) -> (i32, i32) {
    %c0_i32 = arith.constant 0 : i32
    %c0_i32_0 = arith.constant 0 : i32
    %c0_i32_1 = arith.constant 0 : i32
    return %c0_i32, %c0_i32_0 : i32, i32
  }
  func.func @transform_4(%arg0: i32, %arg1: i32) -> (i32, i32) {
    %c0_i32 = arith.constant 0 : i32
    %c0_i32_0 = arith.constant 0 : i32
    %c0_i32_1 = arith.constant 0 : i32
    return %c0_i32, %c0_i32_0 : i32, i32
  }
  func.func @transform_5(%arg0: i32, %arg1: i32) -> (i32, i32) {
    %c0_i32 = arith.constant 0 : i32
    %c0_i32_0 = arith.constant 0 : i32
    %c0_i32_1 = arith.constant 0 : i32
    return %c0_i32, %c0_i32_0 : i32, i32
  }
  func.func @transform_6(%arg0: i32, %arg1: i32) -> (i32, i32) {
    %c0_i32 = arith.constant 0 : i32
    %c0_i32_0 = arith.constant 0 : i32
    %c0_i32_1 = arith.constant 0 : i32
    return %c0_i32, %c0_i32_0 : i32, i32
  }
  func.func @transform_7(%arg0: i32, %arg1: i32) -> (i32, i32) {
    %c0_i32 = arith.constant 0 : i32
    %c0_i32_0 = arith.constant 0 : i32
    return %arg0, %c0_i32 : i32, i32
  }
}

</mosaic_0001>

<bundles_post_ra>
// kernel: tpu_custom_call.1
= control target key start
LH: loop header
LB: loop body
LE: loop exit
PB: predicated region body
PF: predicated region fallthrough
CT: control target
= control target key end

     0   :  { %s4723_s0 = inlined_call_operand.hbm [shape: f32[8,16000], index: 0, kind: input, shape index: {}]   ;;  %s4724_s1 = inlined_call_operand.hbm [shape: bf16[16000,128], index: 1, kind: input, shape index: {}]   ;;  %s4725_s2 = inlined_call_operand.hbm [shape: f32[1,128], index: 2, kind: input, shape index: {}]   ;;  %s4726_s3 = inlined_call_operand.vmem [shape: f32[128,64], index: 3, kind: input, shape index: {}]   ;;  %s4727_s4 = inlined_call_operand.hbm [shape: f32[1,64], index: 4, kind: input, shape index: {}]   ;;  %s4728_s5 = inlined_call_operand.vmem [shape: f32[64,35], index: 5, kind: input, shape index: {}]   ;;  %s4729_s6 = inlined_call_operand.hbm [shape: f32[1,35], index: 6, kind: input, shape index: {}]   ;;  %s4730_s7 = inlined_call_operand.hbm [shape: f32[8,35], index: 7, kind: output, shape index: {}]  }
   0x1   :  { %4734 = sst [smem:[#allocation18_spill]] %s4723_s0 }
   0x2   :  { %4735 = sst [smem:[#allocation19_spill]] %s4725_s2 }
   0x3   :  { %12 = vsyncpa [#allocation4], 0 }
   0x4   :  { %14 = vsyncpa [#allocation4 + $0x1], 0 }
   0x5   :  { %15 = vsyncpa [#allocation7], 0 }
   0x6   :  { %17 = vsyncpa [#allocation7 + $0x1], 0 }
   0x7   :  { %18 = vsyncpa [#allocation10], 0 }
   0x8   :  { %19 = vsyncpa [#allocation5], 0  ;;  %s4136_s24 = smov 0   ;;  %s4138_s25 = smov 0  }
   0x9   :  { %s4140_s26 = smov 0   ;;  %s4142_s27 = smov 0  }
   0xa   :  { %s4144_s28 = smov 0   ;;  %s4146_s29 = smov 0  }
   0xb LB: > { %s4165_s30 = sadd.s32 4294967295, %s4080_s29   ;;  %p59_p0 = scmp.ne.s32.totalorder %s4064_s25, %s4060_s24  ;;  %s4080_s29 = sphi %s4146_s29, %s25_s29   ;;  %s4076_s28 = sphi %s4144_s28, %s4753_s28   ;;  %s4072_s27 = sphi %s4142_s27, %s4752_s27   ;;  %s4068_s26 = sphi %s4140_s26, %s4751_s26   ;;  %s4064_s25 = sphi %s4138_s25, %s4750_s25   ;;  %s4060_s24 = sphi %s4136_s24, %s4749_s24  }
   0xc   : > { %p4731_p1 = scmp.eq.s32.totalorder %s4165_s30, 0  ;;  %p2898_p2 = scmp.ge.s32.totalorder %s4080_s29, 1 }
   0xd   : > { %p227_p3 = scmp.lt.s32.totalorder %s4080_s29, 6  ;;  %s4082_s10 = smov [#allocation8]  }
   0xe   : > { %p4173_p4 = por %p4731_p1, %p59_p0  ;;  %s240_s11 = sshll.u32 %s4082_s10, 4  ;;  %s241_s11 = int_to_ptr.vmem [resolvable:$true] %s240_s11 }
   0xf   : > { %p4177_p5 = pnand %p2898_p2, %p227_p3  ;;  %s4083_s12 = smov [#allocation9]  }
  0x10   : > { %s4736_s8 = scalar_select %p4173_p4, 1, 0 }
  0x11   : > { %s4737_s9 = scalar_select %p4177_p5, 1, 0 }
  0x12   : > { %p3554_p6 = pneg %p4177_p5  ;;  %s254_s13 = sshll.u32 %s4083_s12, 4  ;;  %s4189_s13 = int_to_ptr.vmem [resolvable:$true] %s254_s13 }
  0x13   : > { %s4084_s15 = smov [#allocation11]   ;;  %s4739_s2 = sld [smem:[#allocation19_spill]] }
  0x14   : > { %p4185_p7 = pnand %p3554_p6, %p4731_p1  ;;  %s268_s16 = sshll.u32 %s4084_s15, 4  ;;  %s4191_s16 = int_to_ptr.vmem [resolvable:$true] %s268_s16 }
  0x16   : > { %p4201_p9 = pneg %p4185_p7 }
  0x19   : > { %s3844_s19 = scalar_lea.hbm %s4739_s2, 16 }
  0x1a   : > { %p3845_p8 = scmp.ne.s32.totalorder %s4739_s2, %s3844_s19  ;;  %p3851_p12 = scmp.lt.u32.totalorder %s3844_s19, %s4739_s2 }
  0x1c   : > { %p3847_p10 = pnand %p4201_p9, %p3845_p8 }
  0x1e   : > { %p3848_p11 = pneg %p3847_p10 }
  0x20   : > { %p3853_p13 = pnand %p3851_p12, %p3848_p11 }
  0x22   : > { %3856 = shalt.err (!%p3853_p13)
}
  0x23   : > { %s3857_s10 = scalar_lea.vmem %s241_s11, 16  ;;  %s3864_s12 = scalar_lea.vmem %s241_s11, 32 }
  0x24   : > { %p3858_p0 = scmp.ne.s32.totalorder %s241_s11, %s3857_s10  ;;  %p3865_p6 = scmp.lt.s32.totalorder %s241_s11, %s241_s11 }
  0x25   : > { %p3866_p1 = scmp.lt.s32.totalorder %s3864_s12, %s3857_s10 }
  0x26   : > { %p3860_p2 = pnand %p3858_p0, %p4201_p9 }
  0x27   : > { %p3867_p4 = por %p3866_p1, %p3865_p6 }
  0x28   : > { %p3861_p3 = pneg %p3860_p2 }
  0x2a   : > { %p3868_p5 = pnand %p3867_p4, %p3861_p3 }
  0x2c   : > { %3871 = shalt.err (!%p3868_p5)
}
  0x2d   : > { %3557 = dma.hbm_to_vmem [thread:$0]  (!%p4185_p7), %s4739_s2, 16, %s241_s11, [#allocation7]  }
  0x2e   : > { %s3872_s20 = scalar_lea.hbm %s4727_s4, 16 }
  0x2f   : > { %p3873_p8 = scmp.ne.s32.totalorder %s4727_s4, %s3872_s20  ;;  %p3879_p4 = scmp.lt.u32.totalorder %s3872_s20, %s4727_s4 }
  0x31   : > { %p3875_p10 = pnand %p3873_p8, %p4201_p9 }
  0x33   : > { %p3876_p1 = pneg %p3875_p10 }
  0x35   : > { %p3881_p5 = pnand %p3879_p4, %p3876_p1 }
  0x37   : > { %3884 = shalt.err (!%p3881_p5)
}
  0x38   : > { %s3885_s11 = scalar_lea.vmem %s4189_s13, 16  ;;  %s3892_s12 = scalar_lea.vmem %s4189_s13, 32 }
  0x39   : > { %p3886_p11 = scmp.ne.s32.totalorder %s4189_s13, %s3885_s11  ;;  %p3893_p0 = scmp.lt.s32.totalorder %s4189_s13, %s4189_s13 }
  0x3a   : > { %p3894_p2 = scmp.lt.s32.totalorder %s3892_s12, %s3885_s11 }
  0x3b   : > { %p3888_p12 = pnand %p3886_p11, %p4201_p9 }
  0x3c   : > { %p3895_p3 = por %p3894_p2, %p3893_p0 }
  0x3d   : > { %p3889_p13 = pneg %p3888_p12 }
  0x3f   : > { %p3896_p6 = pnand %p3895_p3, %p3889_p13 }
  0x41   : > { %3899 = shalt.err (!%p3896_p6)
}
  0x42   : > { %3560 = dma.hbm_to_vmem [thread:$0]  (!%p4185_p7), %s4727_s4, 16, %s4189_s13, [#allocation10]  }
  0x43   : > { %s3900_s20 = scalar_lea.hbm %s4729_s6, 16 }
  0x44   : > { %p3901_p8 = scmp.ne.s32.totalorder %s4729_s6, %s3900_s20  ;;  %p3907_p4 = scmp.lt.u32.totalorder %s3900_s20, %s4729_s6 }
  0x46   : > { %p3903_p10 = pnand %p3901_p8, %p4201_p9 }
  0x48   : > { %p3904_p1 = pneg %p3903_p10 }
  0x4a   : > { %p3909_p5 = pnand %p3907_p4, %p3904_p1 }
  0x4c   : > { %3912 = shalt.err (!%p3909_p5)
}
  0x4d   : > { %s3913_s13 = scalar_lea.vmem %s4191_s16, 16  ;;  %s3920_s11 = scalar_lea.vmem %s4191_s16, 32 }
  0x4e   : > { %p3914_p11 = scmp.ne.s32.totalorder %s4191_s16, %s3913_s13  ;;  %p3921_p0 = scmp.lt.s32.totalorder %s4191_s16, %s4191_s16 }
  0x4f   : > { %p3922_p2 = scmp.lt.s32.totalorder %s3920_s11, %s3913_s13 }
  0x50   : > { %p3916_p12 = pnand %p3914_p11, %p4201_p9 }
  0x51   : > { %p3923_p3 = por %p3922_p2, %p3921_p0 }
  0x52   : > { %p3917_p13 = pneg %p3916_p12 }
  0x54   : > { %p3924_p6 = pnand %p3923_p3, %p3917_p13 }
  0x56   : > { %3927 = shalt.err (!%p3924_p6)
}
  0x57   : > { %3563 = dma.hbm_to_vmem [thread:$0]  (!%p4185_p7), %s4729_s6, 16, %s4191_s16, [#allocation10]  }
  0x58   : > { %s46_s22 = sadd.s32 1, %s4068_s26  ;;  %s34_s17 = sadd.s32 1, %s4076_s28 }
  0x59   : > { %p53_p9 = scmp.ne.s32.totalorder %s4068_s26, %s4064_s25  ;;  %p35_p8 = scmp.ge.s32.totalorder %s34_s17, 5 }
  0x5a   : > { %p54_p10 = scmp.eq.s32.totalorder %s4080_s29, 0  ;;  %p3574_p1 = scmp.lt.s32.totalorder %s4080_s29, 5 }
  0x5b   : > { %s4272_s14 = sand.u32 1, %s4068_s26   ;;  %s4755_s17 = smov (%p35_p8, %s34_s17), 0 }
  0x5c   : > { %p55_p4 = por %p54_p10, %p53_p9  ;;  %s42_s18 = ssub.s32 %s4076_s28, %s4755_s17 }
  0x5d   : > { %s3530_s19 = smul.u32 200, %s4272_s14  ;;  %p44_p5 = scmp.eq.s32.totalorder %s42_s18, 0 }
  0x5e   : > { %s3119_s20 = smul.u32 3200, %s4076_s28  ;;  %p4280_p11 = pnand %p3574_p1, %p55_p4 }
  0x5f   : > { %s4285_s21 = scalar_select %p44_p5, %s4068_s26, %s46_s22  }
  0x60   : > { %s4742_s0 = sld [smem:[#allocation18_spill]]  ;;  %s283_s13 = scalar_lea.vmem [#allocation3], %s3530_s19 }
  0x61   : > { %s293_s11 = sshll.u32 %s283_s13, 4  ;;  %s280_s12 = scalar_lea.sflag [#allocation4], %s4272_s14  ;;  %s4292_s11 = int_to_ptr.vmem [resolvable:$true] %s293_s11 }
  0x62   : > { %p3930_p12 = pneg %p4280_p11 }
  0x66   : > { %s4290_s10 = scalar_lea.hbm %s4742_s0, %s3119_s20  ;;  %s3933_s20 = scalar_lea.hbm %s4742_s0, 16000 }
  0x67   : > { %s3928_s15 = scalar_lea.hbm %s4290_s10, 3200  ;;  %p3934_p2 = scmp.lt.u32.totalorder %s4290_s10, %s4742_s0 }
  0x68   : > { %p3929_p7 = scmp.ne.s32.totalorder %s4290_s10, %s3928_s15  ;;  %p3935_p3 = scmp.lt.u32.totalorder %s3933_s20, %s3928_s15 }
  0x69   : > { %p3937_p9 = scmp.lt.u32.totalorder %s3928_s15, %s4290_s10 }
  0x6a   : > { %p3931_p13 = pnand %p3930_p12, %p3929_p7  ;;  %p3936_p6 = por %p3935_p3, %p3934_p2 }
  0x6c   : > { %p3932_p0 = pneg %p3931_p13  ;;  %p3938_p8 = por %p3937_p9, %p3936_p6 }
  0x6e   : > { %p3939_p10 = pnand %p3938_p8, %p3932_p0 }
  0x70   : > { %3942 = shalt.err (!%p3939_p10)
}
  0x71   : > { %s3943_s19 = scalar_lea.vmem %s4292_s11, 3200  ;;  %s4085_s13 = smov [#allocation3]  }
  0x72   : > { %p3944_p1 = scmp.ne.s32.totalorder %s4292_s11, %s3943_s19  ;;  %s3948_s22 = sshll.u32 %s4085_s13, 4  ;;  %s3949_s22 = int_to_ptr.vmem [resolvable:$false] %s3948_s22 }
  0x73   : > { %s3950_s18 = scalar_lea.vmem %s3949_s22, 6400  ;;  %p3951_p7 = scmp.lt.s32.totalorder %s4292_s11, %s3949_s22 }
  0x74   : > { %p3946_p4 = pnand %p3944_p1, %p3930_p12  ;;  %p3952_p13 = scmp.lt.s32.totalorder %s3950_s18, %s3943_s19 }
  0x76   : > { %p3947_p5 = pneg %p3946_p4  ;;  %p3953_p2 = por %p3952_p13, %p3951_p7 }
  0x78   : > { %p3954_p3 = pnand %p3953_p2, %p3947_p5 }
  0x7a   : > { %3957 = shalt.err (!%p3954_p3)
}
  0x7b   : > { %3567 = dma.hbm_to_vmem [thread:$0]  (!%p4280_p11), %s4290_s10, 3200, %s4292_s11, %s280_s12  }
  0x7c   : > { %s3531_s15 = smul.u32 1600, %s4272_s14  ;;  %s300_s20 = sand.u32 1, %s4080_s29  }
  0x7d   : > { %s3120_s23 = smul.u32 25600, %s4076_s28  ;;  %s4330_s18 = scalar_lea.sflag [#allocation7], %s300_s20 }
  0x7e   : > { %s304_s24 = scalar_lea.vmem [#allocation6], %s3531_s15  ;;  %s3963_s0 = scalar_lea.hbm %s4724_s1, 128000 }
  0x7f   : > { %s311_s13 = sshll.u32 %s304_s24, 4  ;;  %s4326_s19 = scalar_lea.hbm %s4724_s1, %s3120_s23  ;;  %s4328_s13 = int_to_ptr.vmem [resolvable:$true] %s311_s13 }
  0x80   : > { %s3958_s2 = scalar_lea.hbm %s4326_s19, 25600  ;;  %p3964_p8 = scmp.lt.u32.totalorder %s4326_s19, %s4724_s1 }
  0x81   : > { %p3959_p0 = scmp.ne.s32.totalorder %s4326_s19, %s3958_s2  ;;  %p3965_p10 = scmp.lt.u32.totalorder %s3963_s0, %s3958_s2 }
  0x82   : > { %p3967_p4 = scmp.lt.u32.totalorder %s3958_s2, %s4326_s19 }
  0x83   : > { %p3961_p6 = pnand %p3959_p0, %p3930_p12  ;;  %p3966_p1 = por %p3965_p10, %p3964_p8 }
  0x85   : > { %p3962_p9 = pneg %p3961_p6  ;;  %p3968_p5 = por %p3967_p4, %p3966_p1 }
  0x87   : > { %p3969_p7 = pnand %p3968_p5, %p3962_p9 }
  0x89   : > { %3972 = shalt.err (!%p3969_p7)
}
  0x8a   : > { %s3973_s15 = scalar_lea.vmem %s4328_s13, 25600  ;;  %s4086_s20 = smov [#allocation6]  }
  0x8b   : > { %p3974_p13 = scmp.ne.s32.totalorder %s4328_s13, %s3973_s15  ;;  %s3978_s23 = sshll.u32 %s4086_s20, 4  ;;  %s3979_s23 = int_to_ptr.vmem [resolvable:$false] %s3978_s23 }
  0x8c   : > { %s3980_s24 = scalar_lea.vmem %s3979_s23, 51200  ;;  %p3981_p0 = scmp.lt.s32.totalorder %s4328_s13, %s3979_s23 }
  0x8d   : > { %p3976_p2 = pnand %p3974_p13, %p3930_p12  ;;  %p3982_p6 = scmp.lt.s32.totalorder %s3980_s24, %s3973_s15 }
  0x8f   : > { %p3977_p3 = pneg %p3976_p2  ;;  %p3983_p8 = por %p3982_p6, %p3981_p0 }
  0x91   : > { %p3984_p10 = pnand %p3983_p8, %p3977_p3 }
  0x93   : > { %3987 = shalt.err (!%p3984_p10)
}
  0x94   : > { %s4087_s2 = smov 64   ;;  %s4088_s22 = smov 4  }
  0x95   : > { %3570 = dma.hbm_to_vmem [thread:$0]  (!%p4280_p11), %s4326_s19, 25600, %s4328_s13, %s4330_s18, %s4087_s2, %s4087_s2, %s4088_s22  }
  0x96   : > { %p4743_p12 = scmp.ne.s32.totalorder %s4737_s9, 0 }
  0x97   : > { %s325_s14 = sand.u32 (!%p4743_p12), 1, %s4064_s25   ;;  %p4744_p9 = scmp.ne.s32.totalorder (!%p4743_p12), %s4736_s8, 0 }
  0x98   : > { %323 = sbr.rel (%p4743_p12) target bundleno = 1406 (0x57e), region = 48  ;;  %s326_s0 = scalar_lea.sflag (!%p4743_p12), [#allocation4], %s325_s14 }
  0x99   : > { %s3532_s10 = smul.u32 (!%p4743_p12), 200, %s325_s14 }
  0x9b   : > { %s4359_s11 = scalar_lea.vmem (!%p4743_p12), [#allocation3], %s3532_s10 }
  0x9f   : > { %4039 = dma.done.wait (%p4744_p9), %s326_s0, 3200  }
  0xa0   : > { %4041 = vsyncadd (%p4744_p9), %s326_s0, 4294964096  ;;  %s334_s12 = sand.u32 1, %s4165_s30   ;;  %s3533_s16 = smul.u32 1600, %s325_s14 }
  0xa1   : > { %s335_s13 = scalar_lea.sflag [#allocation7], %s334_s12 }
  0xa2   : > { %s4366_s19 = scalar_lea.vmem [#allocation6], %s3533_s16 }
  0xa3   : > { %4043 = dma.done.wait (%p4744_p9), %s335_s13, 25600  }
  0xa4   : > { %4045 = vsyncadd (%p4744_p9), %s335_s13, 4294941696  ;;  %p4745_p11 = scmp.eq.s32.totalorder %s4165_s30, 0 }
  0xa6   : > { %4047 = dma.done.wait (%p4745_p11), [#allocation7], 16   ;;  %p4746_p1 = pmov %p4745_p11 }
  0xa8   : > { %4049 = vsyncadd (%p4746_p1), [#allocation7], 4294967280  ;;  %p4747_p4 = pmov %p4746_p1 }
  0xa9   : > { %p4748_p5 = pmov %p4746_p1 }
  0xaa   : > { %4051 = dma.done.wait (%p4747_p4), [#allocation10], 32  }
  0xab   : > { %4053 = vsyncadd (%p4748_p5), [#allocation10], 4294967264  ;;  %p2909_p7 = scmp.ne.s32.totalorder %s4072_s27, 0 }
  0xac   : > { %v4089_v0 = vmov (!%p2909_p7), 0.0  }
  0xad   : > { %387 = sbr.rel (%p2909_p7) target bundleno = 180 (0xb4), region = 72  ;;  %388 = vst [vmem:[#allocation2] sm:$0xff] (!%p2909_p7), %v4089_v0 }
  0xb4 PF: > { %v3640_v1 = vld [vmem:[%s4366_s19 + $0x40] sm:$0xff]   ;;  %v3644_v5 = vld [vmem:[%s4366_s19 + $0x48] sm:$0xff]   ;;  %v3648_v9 = vld [vmem:[%s4366_s19 + $0x50] sm:$0xff]   ;;  %vm4091_vm0 = vmmov 0   ;;  %p3110_p13 = scmp.ne.s32.totalorder %s4072_s27, 4 }
  0xb5   : > { %v3641_v2 = vld [vmem:[%s4366_s19 + $0xc0] sm:$0xff]   ;;  %3121 = vmatprep.subr.bf16.mxu0 %v3640_v1  ;;  %v3645_v6 = vld [vmem:[%s4366_s19 + $0xc8] sm:$0xff]   ;;  %v3649_v10 = vld [vmem:[%s4366_s19 + $0xd0] sm:$0xff]   ;;  %vm4093_vm1 = vmmov (!%p3110_p13), 0   ;;  %vm2685_vm2 = vcmask (!%p3110_p13), 523264   ;;  %vm2759_vm3 = vcmask (!%p3110_p13), 285696  }
  0xb6   : > { %v3642_v3 = vld [vmem:[%s4366_s19] sm:$0xff]   ;;  %3143 = vmatprep.subr.bf16.mxu1 %v3641_v2  ;;  %v3646_v7 = vld [vmem:[%s4366_s19 + $0x8] sm:$0xff]   ;;  %v3650_v11 = vld [vmem:[%s4366_s19 + $0x10] sm:$0xff]  }
  0xb7   : > { %v3643_v4 = vld [vmem:[%s4366_s19 + $0x80] sm:$0xff]   ;;  %3122 = vmatpush3.bf16.msra.mxu0 %v3642_v3  ;;  %v3647_v8 = vld [vmem:[%s4366_s19 + $0x88] sm:$0xff]   ;;  %v3651_v12 = vld [vmem:[%s4366_s19 + $0x90] sm:$0xff]  }
  0xb8   : > { %3144 = vmatpush3.bf16.msra.mxu1 %v3643_v4  ;;  %3123 = vmatprep.subr.bf16.mxu0 %v3644_v5  ;;  %v3652_v13 = vld [vmem:[%s4366_s19 + $0x58] sm:$0xff]   ;;  %v3656_v17 = vld [vmem:[%s4366_s19 + $0x60] sm:$0xff]   ;;  %v3660_v21 = vld [vmem:[%s4366_s19 + $0x68] sm:$0xff]  }
  0xb9   : > { %3145 = vmatprep.subr.bf16.mxu1 %v3645_v6  ;;  %v3653_v14 = vld [vmem:[%s4366_s19 + $0xd8] sm:$0xff]   ;;  %v3657_v18 = vld [vmem:[%s4366_s19 + $0xe0] sm:$0xff]   ;;  %v3661_v22 = vld [vmem:[%s4366_s19 + $0xe8] sm:$0xff]  }
  0xba   : > { %v3654_v15 = vld [vmem:[%s4366_s19 + $0x18] sm:$0xff]   ;;  %v3658_v19 = vld [vmem:[%s4366_s19 + $0x20] sm:$0xff]   ;;  %v3662_v23 = vld [vmem:[%s4366_s19 + $0x28] sm:$0xff]  }
  0xbb   : > { %3124 = vmatpush3.bf16.msra.mxu0 %v3646_v7  ;;  %v3655_v16 = vld [vmem:[%s4366_s19 + $0x98] sm:$0xff]   ;;  %v3659_v20 = vld [vmem:[%s4366_s19 + $0xa0] sm:$0xff]   ;;  %v3663_v24 = vld [vmem:[%s4366_s19 + $0xa8] sm:$0xff]  }
  0xbc   : > { %3146 = vmatpush3.bf16.msra.mxu1 %v3647_v8  ;;  %3125 = vmatprep.subr.bf16.mxu0 %v3648_v9  ;;  %v3664_v25 = vld [vmem:[%s4366_s19 + $0x70] sm:$0xff]   ;;  %v3668_v29 = vld [vmem:[%s4366_s19 + $0x78] sm:$0xff]   ;;  %v392_v39 = vld [vmem:[%s4359_s11 + $0x10] sm:$0xff] }
  0xbd   : > { %3147 = vmatprep.subr.bf16.mxu1 %v3649_v10  ;;  %v3665_v26 = vld [vmem:[%s4366_s19 + $0xf0] sm:$0xff]   ;;  %v3669_v30 = vld [vmem:[%s4366_s19 + $0xf8] sm:$0xff]   ;;  %v417_v40 = vpack.c.bf16 %v392_v39, %v392_v39  ;;  %v3672_v41 = vld [vmem:[%s4366_s19 + $0x140] sm:$0xff]  }
  0xbe   : > { %v3666_v27 = vld [vmem:[%s4366_s19 + $0x30] sm:$0xff]   ;;  %v3670_v31 = vld [vmem:[%s4366_s19 + $0x38] sm:$0xff]   ;;  %v3673_v42 = vld [vmem:[%s4366_s19 + $0x100] sm:$0xff]  }
  0xbf   : > { %3126 = vmatpush3.bf16.msra.mxu0 %v3650_v11  ;;  %v3667_v28 = vld [vmem:[%s4366_s19 + $0xb0] sm:$0xff]   ;;  %v3671_v32 = vld [vmem:[%s4366_s19 + $0xb8] sm:$0xff]   ;;  %v3674_v43 = vld [vmem:[%s4366_s19 + $0x1c0] sm:$0xff]  }
  0xc0   : > { %3148 = vmatpush3.bf16.msra.mxu1 %v3651_v12  ;;  %3127 = vmatprep.subr.bf16.mxu0 %v3652_v13  ;;  %v391_v33 = vld [vmem:[%s4359_s11 + $0x8] sm:$0xff]  ;;  %v393_v34 = vld [vmem:[%s4359_s11 + $0x18] sm:$0xff]  ;;  %v390_v35 = vld [vmem:[%s4359_s11] sm:$0xff] }
  0xc1   : > { %3149 = vmatprep.subr.bf16.mxu1 %v3653_v14  ;;  %v416_v36 = vpack.c.bf16 %v391_v33, %v391_v33  ;;  %v418_v37 = vpack.c.bf16 %v393_v34, %v393_v34  ;;  %v415_v38 = vpack.c.bf16 %v390_v35, %v390_v35  ;;  %v3675_v44 = vld [vmem:[%s4366_s19 + $0x180] sm:$0xff]   ;;  %v3676_v45 = vld [vmem:[%s4366_s19 + $0x148] sm:$0xff]   ;;  %v3680_v49 = vld [vmem:[%s4366_s19 + $0x150] sm:$0xff]  }
  0xc2   : > { %v3677_v46 = vld [vmem:[%s4366_s19 + $0x108] sm:$0xff]   ;;  %v3681_v50 = vld [vmem:[%s4366_s19 + $0x110] sm:$0xff]   ;;  %v3684_v53 = vld [vmem:[%s4366_s19 + $0x158] sm:$0xff]  }
  0xc3   : > { %3128 = vmatpush3.bf16.msra.mxu0 %v3654_v15  ;;  %2072 = vmatprep.mubr.bf16.mxu0 %v416_v36  ;;  %v3678_v47 = vld [vmem:[%s4366_s19 + $0x1c8] sm:$0xff]   ;;  %v3682_v51 = vld [vmem:[%s4366_s19 + $0x1d0] sm:$0xff]   ;;  %v3685_v54 = vld [vmem:[%s4366_s19 + $0x118] sm:$0xff]  }
  0xc4   : > { %3150 = vmatpush3.bf16.msra.mxu1 %v3655_v16  ;;  %3129 = vmatprep.subr.bf16.mxu0 %v3656_v17  ;;  %v3679_v48 = vld [vmem:[%s4366_s19 + $0x188] sm:$0xff]   ;;  %v3683_v52 = vld [vmem:[%s4366_s19 + $0x190] sm:$0xff]   ;;  %v3686_v55 = vld [vmem:[%s4366_s19 + $0x1d8] sm:$0xff]  }
  0xc5   : > { %3151 = vmatprep.subr.bf16.mxu1 %v3657_v18  ;;  %2112 = vmatprep.mubr.bf16.mxu1 %v418_v37  ;;  %v3687_v56 = vld [vmem:[%s4366_s19 + $0x198] sm:$0xff]   ;;  %v3688_v57 = vld [vmem:[%s4366_s19 + $0x160] sm:$0xff]   ;;  %v3692_v61 = vld [vmem:[%s4366_s19 + $0x168] sm:$0xff]  }
  0xc6   : > { %v3689_v58 = vld [vmem:[%s4366_s19 + $0x120] sm:$0xff]   ;;  %v3693_v62 = vld [vmem:[%s4366_s19 + $0x128] sm:$0xff]   ;;  %v3696_v1 = vld [vmem:[%s4366_s19 + $0x170] sm:$0xff]  }
  0xc7   : > { %3130 = vmatpush3.bf16.msra.mxu0 %v3658_v19  ;;  %v3690_v59 = vld [vmem:[%s4366_s19 + $0x1e0] sm:$0xff]   ;;  %v3694_v63 = vld [vmem:[%s4366_s19 + $0x1e8] sm:$0xff]   ;;  %v3697_v2 = vld [vmem:[%s4366_s19 + $0x130] sm:$0xff]  }
  0xc8   : > { %3152 = vmatpush3.bf16.msra.mxu1 %v3659_v20  ;;  %3131 = vmatprep.subr.bf16.mxu0 %v3660_v21  ;;  %v3691_v60 = vld [vmem:[%s4366_s19 + $0x1a0] sm:$0xff]   ;;  %v3695_v0 = vld [vmem:[%s4366_s19 + $0x1a8] sm:$0xff]   ;;  %v3698_v3 = vld [vmem:[%s4366_s19 + $0x1f0] sm:$0xff]  }
  0xc9   : > { %3153 = vmatprep.subr.bf16.mxu1 %v3661_v22  ;;  %v3699_v4 = vld [vmem:[%s4366_s19 + $0x1b0] sm:$0xff]   ;;  %v3700_v5 = vld [vmem:[%s4366_s19 + $0x178] sm:$0xff]   ;;  %v3704_v13 = vld [vmem:[%s4366_s19 + $0x240] sm:$0xff]  }
  0xca   : > { %v3701_v6 = vld [vmem:[%s4366_s19 + $0x138] sm:$0xff]   ;;  %v397_v14 = vld [vmem:[%s4359_s11 + $0x38] sm:$0xff]  ;;  %v3705_v16 = vld [vmem:[%s4366_s19 + $0x200] sm:$0xff]  }
  0xcb   : > { %3132 = vmatpush3.bf16.msra.mxu0 %v3662_v23  ;;  %v3702_v7 = vld [vmem:[%s4366_s19 + $0x1f8] sm:$0xff]   ;;  %v422_v15 = vpack.c.bf16 %v397_v14, %v397_v14  ;;  %v396_v17 = vld [vmem:[%s4359_s11 + $0x30] sm:$0xff] }
  0xcc   : > { %3154 = vmatpush3.bf16.msra.mxu1 %v3663_v24  ;;  %3133 = vmatprep.subr.bf16.mxu0 %v3664_v25  ;;  %v395_v8 = vld [vmem:[%s4359_s11 + $0x28] sm:$0xff]  ;;  %v394_v11 = vld [vmem:[%s4359_s11 + $0x20] sm:$0xff]  ;;  %v421_v18 = vpack.c.bf16 %v396_v17, %v396_v17  ;;  %v3708_v21 = vld [vmem:[%s4366_s19 + $0x248] sm:$0xff]  }
  0xcd   : > { %3155 = vmatprep.subr.bf16.mxu1 %v3665_v26  ;;  %v420_v9 = vpack.c.bf16 %v395_v8, %v395_v8  ;;  %v3703_v10 = vld [vmem:[%s4366_s19 + $0x1b8] sm:$0xff]   ;;  %v419_v12 = vpack.c.bf16 %v394_v11, %v394_v11  ;;  %v3706_v19 = vld [vmem:[%s4366_s19 + $0x2c0] sm:$0xff]   ;;  %v3709_v22 = vld [vmem:[%s4366_s19 + $0x208] sm:$0xff]  }
  0xce   : > { %v3707_v20 = vld [vmem:[%s4366_s19 + $0x280] sm:$0xff]   ;;  %v3710_v23 = vld [vmem:[%s4366_s19 + $0x2c8] sm:$0xff]   ;;  %v3712_v25 = vld [vmem:[%s4366_s19 + $0x250] sm:$0xff]  }
  0xcf   : > { %3134 = vmatpush3.bf16.msra.mxu0 %v3666_v27  ;;  %v3711_v24 = vld [vmem:[%s4366_s19 + $0x288] sm:$0xff]   ;;  %v3713_v26 = vld [vmem:[%s4366_s19 + $0x210] sm:$0xff]   ;;  %v3720_v33 = vld [vmem:[%s4366_s19 + $0x260] sm:$0xff]  }
  0xd0   : > { %3156 = vmatpush3.bf16.msra.mxu1 %v3667_v28  ;;  %3135 = vmatprep.subr.bf16.mxu0 %v3668_v29  ;;  %v3714_v27 = vld [vmem:[%s4366_s19 + $0x2d0] sm:$0xff]   ;;  %v3716_v29 = vld [vmem:[%s4366_s19 + $0x258] sm:$0xff]   ;;  %v3721_v34 = vld [vmem:[%s4366_s19 + $0x220] sm:$0xff]  }
  0xd1   : > { %3157 = vmatprep.subr.bf16.mxu1 %v3669_v30  ;;  %v3715_v28 = vld [vmem:[%s4366_s19 + $0x290] sm:$0xff]   ;;  %v3717_v30 = vld [vmem:[%s4366_s19 + $0x218] sm:$0xff]   ;;  %v3722_v35 = vld [vmem:[%s4366_s19 + $0x2e0] sm:$0xff]  }
  0xd2   : > { %v3723_v36 = vld [vmem:[%s4366_s19 + $0x2a0] sm:$0xff]   ;;  %v3724_v37 = vld [vmem:[%s4366_s19 + $0x268] sm:$0xff]   ;;  %v3751_v8 = vld [vmem:[%s4366_s19 + $0x398] sm:$0xff]  }
  0xd3   : > { %3136 = vmatpush3.bf16.msra.mxu0 %v3670_v31  ;;  %v3718_v31 = vld [vmem:[%s4366_s19 + $0x2d8] sm:$0xff]   ;;  %v3726_v39 = vld [vmem:[%s4366_s19 + $0x2e8] sm:$0xff]   ;;  %v3754_v11 = vld [vmem:[%s4366_s19 + $0x3e0] sm:$0xff]  }
  0xd4   : > { %3158 = vmatpush3.bf16.msra.mxu1 %v3671_v32  ;;  %3165 = vmatprep.subr.bf16.mxu0 %v3672_v41  ;;  %v3719_v32 = vld [vmem:[%s4366_s19 + $0x298] sm:$0xff]   ;;  %v3728_v41 = vld [vmem:[%s4366_s19 + $0x270] sm:$0xff]   ;;  %v3757_v14 = vld [vmem:[%s4366_s19 + $0x328] sm:$0xff]  }
  0xd5   : > { %3187 = vmatprep.subr.bf16.mxu1 %v3674_v43  ;;  %v3730_v43 = vld [vmem:[%s4366_s19 + $0x2f0] sm:$0xff]  }
  0xd6   : > { %2073 = vmatmul.mubr.bf16.vlgmr.msra.gmra.mrb[0].mxu0 %v415_v38  ;;  %v3725_v38 = vld [vmem:[%s4366_s19 + $0x228] sm:$0xff]   ;;  %v3760_v17 = vld [vmem:[%s4366_s19 + $0x370] sm:$0xff]  }
  0xd7   : > { %2113 = vmatmul.mubr.bf16.vlgmr.msra.gmra.mrb[0].mxu1 %v417_v40  ;;  %3166 = vmatpush3.bf16.msra.mxu0 %v3673_v42  ;;  %v3727_v40 = vld [vmem:[%s4366_s19 + $0x2a8] sm:$0xff]   ;;  %v3729_v42 = vld [vmem:[%s4366_s19 + $0x230] sm:$0xff]  }
  0xd8   : > { %3188 = vmatpush3.bf16.msra.mxu1 %v3675_v44  ;;  %3167 = vmatprep.subr.bf16.mxu0 %v3676_v45  ;;  %v3731_v44 = vld [vmem:[%s4366_s19 + $0x2b0] sm:$0xff]   ;;  %v3732_v45 = vld [vmem:[%s4366_s19 + $0x278] sm:$0xff]  }
  0xd9   : > { %3189 = vmatprep.subr.bf16.mxu1 %v3678_v47  ;;  %2152 = vmatprep.mubr.bf16.mxu0 %v420_v9  ;;  %v3734_v47 = vld [vmem:[%s4366_s19 + $0x2f8] sm:$0xff]   ;;  %v3752_v9 = vld [vmem:[%s4366_s19 + $0x360] sm:$0xff]  }
  0xda   : > { %2192 = vmatprep.mubr.bf16.mxu1 %v422_v15  ;;  %v3758_v15 = vld [vmem:[%s4366_s19 + $0x3e8] sm:$0xff]  }
  0xdb   : > { %3168 = vmatpush3.bf16.msra.mxu0 %v3677_v46  ;;  %v3733_v46 = vld [vmem:[%s4366_s19 + $0x238] sm:$0xff]  }
  0xdc   : > { %3190 = vmatpush3.bf16.msra.mxu1 %v3679_v48  ;;  %3169 = vmatprep.subr.bf16.mxu0 %v3680_v49  ;;  %v399_v48 = vld [vmem:[%s4359_s11 + $0x48] sm:$0xff] }
  0xdd   : > { %3191 = vmatprep.subr.bf16.mxu1 %v3682_v51  ;;  %v424_v49 = vpack.c.bf16 %v399_v48, %v399_v48  ;;  %v398_v51 = vld [vmem:[%s4359_s11 + $0x40] sm:$0xff] }
  0xde   : > { %v3783_v48 = vld [vmem:[%s4366_s19 + $0x498] sm:$0xff]  }
  0xdf   : > { %3170 = vmatpush3.bf16.msra.mxu0 %v3681_v50  ;;  %v3735_v50 = vld [vmem:[%s4366_s19 + $0x2b8] sm:$0xff]  }
  0xe0   : > { %3192 = vmatpush3.bf16.msra.mxu1 %v3683_v52  ;;  %3171 = vmatprep.subr.bf16.mxu0 %v3684_v53  ;;  %v423_v52 = vpack.c.bf16 %v398_v51, %v398_v51  ;;  %v3736_v53 = vld [vmem:[%s4366_s19 + $0x340] sm:$0xff]  }
  0xe1   : > { %3193 = vmatprep.subr.bf16.mxu1 %v3686_v55  ;;  %v3786_v51 = vld [vmem:[%s4366_s19 + $0x4e0] sm:$0xff]  }
  0xe3   : > { %3172 = vmatpush3.bf16.msra.mxu0 %v3685_v54  ;;  %v401_v54 = vld [vmem:[%s4359_s11 + $0x58] sm:$0xff] }
  0xe4   : > { %3194 = vmatpush3.bf16.msra.mxu1 %v3687_v56  ;;  %3173 = vmatprep.subr.bf16.mxu0 %v3688_v57  ;;  %v426_v55 = vpack.c.bf16 %v401_v54, %v401_v54  ;;  %v3737_v56 = vld [vmem:[%s4366_s19 + $0x300] sm:$0xff]   ;;  %v3789_v54 = vld [vmem:[%s4366_s19 + $0x428] sm:$0xff]  }
  0xe5   : > { %3195 = vmatprep.subr.bf16.mxu1 %v3690_v59  ;;  %v400_v57 = vld [vmem:[%s4359_s11 + $0x50] sm:$0xff] }
  0xe6   : > { %v3738_v59 = vld [vmem:[%s4366_s19 + $0x3c0] sm:$0xff]  }
  0xe7   : > { %3174 = vmatpush3.bf16.msra.mxu0 %v3689_v58  ;;  %v425_v58 = vpack.c.bf16 %v400_v57, %v400_v57  ;;  %v3792_v57 = vld [vmem:[%s4366_s19 + $0x470] sm:$0xff]  }
  0xe8   : > { %3196 = vmatpush3.bf16.msra.mxu1 %v3691_v60  ;;  %3175 = vmatprep.subr.bf16.mxu0 %v3692_v61  ;;  %v3739_v60 = vld [vmem:[%s4366_s19 + $0x380] sm:$0xff]   ;;  %v3740_v61 = vld [vmem:[%s4366_s19 + $0x348] sm:$0xff]  }
  0xe9   : > { %3197 = vmatprep.subr.bf16.mxu1 %v3694_v63  ;;  %v3742_v63 = vld [vmem:[%s4366_s19 + $0x3c8] sm:$0xff]  }
  0xeb   : > { %3176 = vmatpush3.bf16.msra.mxu0 %v3693_v62  ;;  %v3741_v62 = vld [vmem:[%s4366_s19 + $0x308] sm:$0xff]  }
  0xec   : > { %3198 = vmatpush3.bf16.msra.mxu1 %v3695_v0  ;;  %3177 = vmatprep.subr.bf16.mxu0 %v3696_v1  ;;  %v3743_v0 = vld [vmem:[%s4366_s19 + $0x388] sm:$0xff]   ;;  %v3744_v1 = vld [vmem:[%s4366_s19 + $0x350] sm:$0xff]  }
  0xed   : > { %3199 = vmatprep.subr.bf16.mxu1 %v3698_v3  ;;  %v3746_v3 = vld [vmem:[%s4366_s19 + $0x3d0] sm:$0xff]  }
  0xef   : > { %3178 = vmatpush3.bf16.msra.mxu0 %v3697_v2  ;;  %v3745_v2 = vld [vmem:[%s4366_s19 + $0x310] sm:$0xff]  }
  0xf0   : > { %3200 = vmatpush3.bf16.msra.mxu1 %v3699_v4  ;;  %3179 = vmatprep.subr.bf16.mxu0 %v3700_v5  ;;  %v3747_v4 = vld [vmem:[%s4366_s19 + $0x390] sm:$0xff]   ;;  %v3748_v5 = vld [vmem:[%s4366_s19 + $0x358] sm:$0xff]  }
  0xf1   : > { %3201 = vmatprep.subr.bf16.mxu1 %v3702_v7  ;;  %v3750_v7 = vld [vmem:[%s4366_s19 + $0x3d8] sm:$0xff]  }
  0xf3   : > { %3180 = vmatpush3.bf16.msra.mxu0 %v3701_v6  ;;  %v3749_v6 = vld [vmem:[%s4366_s19 + $0x318] sm:$0xff]  }
  0xf4   : > { %3202 = vmatpush3.bf16.msra.mxu1 %v3703_v10  ;;  %3209 = vmatprep.subr.bf16.mxu0 %v3704_v13  ;;  %v3753_v10 = vld [vmem:[%s4366_s19 + $0x320] sm:$0xff]   ;;  %v3756_v13 = vld [vmem:[%s4366_s19 + $0x368] sm:$0xff]  }
  0xf5   : > { %3231 = vmatprep.subr.bf16.mxu1 %v3706_v19  ;;  %v3762_v19 = vld [vmem:[%s4366_s19 + $0x3f0] sm:$0xff]  }
  0xf6   : > { %2153 = vmatmul.mubr.bf16.vlgmr.msra.gmra.mrb[4].mxu0 %v419_v12  ;;  %v3755_v12 = vld [vmem:[%s4366_s19 + $0x3a0] sm:$0xff]  }
  0xf7   : > { %3210 = vmatpush3.bf16.msra.mxu0 %v3705_v16  ;;  %2193 = vmatmul.mubr.bf16.vlgmr.msra.gmra.mrb[4].mxu1 %v421_v18  ;;  %v3759_v16 = vld [vmem:[%s4366_s19 + $0x3a8] sm:$0xff]   ;;  %v3761_v18 = vld [vmem:[%s4366_s19 + $0x330] sm:$0xff]  }
  0xf8   : > { %3232 = vmatpush3.bf16.msra.mxu1 %v3707_v20  ;;  %3211 = vmatprep.subr.bf16.mxu0 %v3708_v21  ;;  %v3763_v20 = vld [vmem:[%s4366_s19 + $0x3b0] sm:$0xff]   ;;  %v3764_v21 = vld [vmem:[%s4366_s19 + $0x378] sm:$0xff]  }
  0xf9   : > { %3233 = vmatprep.subr.bf16.mxu1 %v3710_v23  ;;  %2232 = vmatprep.mubr.bf16.mxu0 %v424_v49  ;;  %v3766_v23 = vld [vmem:[%s4366_s19 + $0x3f8] sm:$0xff]   ;;  %v3784_v49 = vld [vmem:[%s4366_s19 + $0x460] sm:$0xff]  }
  0xfa   : > { %2272 = vmatprep.mubr.bf16.mxu1 %v426_v55  ;;  %v3790_v55 = vld [vmem:[%s4366_s19 + $0x4e8] sm:$0xff]  }
  0xfb   : > { %3212 = vmatpush3.bf16.msra.mxu0 %v3709_v22  ;;  %v3765_v22 = vld [vmem:[%s4366_s19 + $0x338] sm:$0xff]  }
  0xfc   : > { %3234 = vmatpush3.bf16.msra.mxu1 %v3711_v24  ;;  %3213 = vmatprep.subr.bf16.mxu0 %v3712_v25  ;;  %v403_v24 = vld [vmem:[%s4359_s11 + $0x68] sm:$0xff] }
  0xfd   : > { %3235 = vmatprep.subr.bf16.mxu1 %v3714_v27  ;;  %v428_v25 = vpack.c.bf16 %v403_v24, %v403_v24  ;;  %v402_v27 = vld [vmem:[%s4359_s11 + $0x60] sm:$0xff] }
  0xfe   : > { %v3815_v24 = vld [vmem:[%s4366_s19 + $0x598] sm:$0xff]  }
  0xff   : > { %3214 = vmatpush3.bf16.msra.mxu0 %v3713_v26  ;;  %v3767_v26 = vld [vmem:[%s4366_s19 + $0x3b8] sm:$0xff]  }
 0x100   : > { %3236 = vmatpush3.bf16.msra.mxu1 %v3715_v28  ;;  %3215 = vmatprep.subr.bf16.mxu0 %v3716_v29  ;;  %v427_v28 = vpack.c.bf16 %v402_v27, %v402_v27  ;;  %v3768_v29 = vld [vmem:[%s4366_s19 + $0x440] sm:$0xff]  }
 0x101   : > { %3237 = vmatprep.subr.bf16.mxu1 %v3718_v31  ;;  %v3818_v27 = vld [vmem:[%s4366_s19 + $0x5e0] sm:$0xff]  }
 0x103   : > { %3216 = vmatpush3.bf16.msra.mxu0 %v3717_v30  ;;  %v405_v30 = vld [vmem:[%s4359_s11 + $0x78] sm:$0xff] }
 0x104   : > { %3238 = vmatpush3.bf16.msra.mxu1 %v3719_v32  ;;  %3217 = vmatprep.subr.bf16.mxu0 %v3720_v33  ;;  %v430_v31 = vpack.c.bf16 %v405_v30, %v405_v30  ;;  %v3769_v32 = vld [vmem:[%s4366_s19 + $0x400] sm:$0xff]   ;;  %v3821_v30 = vld [vmem:[%s4366_s19 + $0x528] sm:$0xff]  }
 0x105   : > { %3239 = vmatprep.subr.bf16.mxu1 %v3722_v35  ;;  %v404_v33 = vld [vmem:[%s4359_s11 + $0x70] sm:$0xff] }
 0x106   : > { %v3770_v35 = vld [vmem:[%s4366_s19 + $0x4c0] sm:$0xff]  }
 0x107   : > { %3218 = vmatpush3.bf16.msra.mxu0 %v3721_v34  ;;  %v429_v34 = vpack.c.bf16 %v404_v33, %v404_v33  ;;  %v3824_v33 = vld [vmem:[%s4366_s19 + $0x570] sm:$0xff]  }
 0x108   : > { %3240 = vmatpush3.bf16.msra.mxu1 %v3723_v36  ;;  %3219 = vmatprep.subr.bf16.mxu0 %v3724_v37  ;;  %v3771_v36 = vld [vmem:[%s4366_s19 + $0x480] sm:$0xff]   ;;  %v3772_v37 = vld [vmem:[%s4366_s19 + $0x448] sm:$0xff]  }
 0x109   : > { %3241 = vmatprep.subr.bf16.mxu1 %v3726_v39  ;;  %v3774_v39 = vld [vmem:[%s4366_s19 + $0x4c8] sm:$0xff]  }
 0x10b   : > { %3220 = vmatpush3.bf16.msra.mxu0 %v3725_v38  ;;  %v3773_v38 = vld [vmem:[%s4366_s19 + $0x408] sm:$0xff]  }
 0x10c   : > { %3242 = vmatpush3.bf16.msra.mxu1 %v3727_v40  ;;  %3221 = vmatprep.subr.bf16.mxu0 %v3728_v41  ;;  %v3775_v40 = vld [vmem:[%s4366_s19 + $0x488] sm:$0xff]   ;;  %v3776_v41 = vld [vmem:[%s4366_s19 + $0x450] sm:$0xff]  }
 0x10d   : > { %3243 = vmatprep.subr.bf16.mxu1 %v3730_v43  ;;  %v3778_v43 = vld [vmem:[%s4366_s19 + $0x4d0] sm:$0xff]  }
 0x10f   : > { %3222 = vmatpush3.bf16.msra.mxu0 %v3729_v42  ;;  %v3777_v42 = vld [vmem:[%s4366_s19 + $0x410] sm:$0xff]  }
 0x110   : > { %3244 = vmatpush3.bf16.msra.mxu1 %v3731_v44  ;;  %3223 = vmatprep.subr.bf16.mxu0 %v3732_v45  ;;  %v3779_v44 = vld [vmem:[%s4366_s19 + $0x490] sm:$0xff]   ;;  %v3780_v45 = vld [vmem:[%s4366_s19 + $0x458] sm:$0xff]  }
 0x111   : > { %3245 = vmatprep.subr.bf16.mxu1 %v3734_v47  ;;  %v3782_v47 = vld [vmem:[%s4366_s19 + $0x4d8] sm:$0xff]  }
 0x113   : > { %3224 = vmatpush3.bf16.msra.mxu0 %v3733_v46  ;;  %v3781_v46 = vld [vmem:[%s4366_s19 + $0x418] sm:$0xff]  }
 0x114   : > { %3246 = vmatpush3.bf16.msra.mxu1 %v3735_v50  ;;  %3253 = vmatprep.subr.bf16.mxu0 %v3736_v53  ;;  %v3785_v50 = vld [vmem:[%s4366_s19 + $0x420] sm:$0xff]   ;;  %v3788_v53 = vld [vmem:[%s4366_s19 + $0x468] sm:$0xff]  }
 0x115   : > { %3275 = vmatprep.subr.bf16.mxu1 %v3738_v59  ;;  %v3794_v59 = vld [vmem:[%s4366_s19 + $0x4f0] sm:$0xff]  }
 0x116   : > { %2233 = vmatmul.mubr.bf16.vlgmr.msra.gmra.mrb[8].mxu0 %v423_v52  ;;  %v3787_v52 = vld [vmem:[%s4366_s19 + $0x4a0] sm:$0xff]  }
 0x117   : > { %3254 = vmatpush3.bf16.msra.mxu0 %v3737_v56  ;;  %2273 = vmatmul.mubr.bf16.vlgmr.msra.gmra.mrb[8].mxu1 %v425_v58  ;;  %v3791_v56 = vld [vmem:[%s4366_s19 + $0x4a8] sm:$0xff]   ;;  %v3793_v58 = vld [vmem:[%s4366_s19 + $0x430] sm:$0xff]  }
 0x118   : > { %3276 = vmatpush3.bf16.msra.mxu1 %v3739_v60  ;;  %3255 = vmatprep.subr.bf16.mxu0 %v3740_v61  ;;  %v3795_v60 = vld [vmem:[%s4366_s19 + $0x4b0] sm:$0xff]   ;;  %v3796_v61 = vld [vmem:[%s4366_s19 + $0x478] sm:$0xff]  }
 0x119   : > { %3277 = vmatprep.subr.bf16.mxu1 %v3742_v63  ;;  %2312 = vmatprep.mubr.bf16.mxu0 %v428_v25  ;;  %v3798_v63 = vld [vmem:[%s4366_s19 + $0x4f8] sm:$0xff]   ;;  %v3816_v25 = vld [vmem:[%s4366_s19 + $0x560] sm:$0xff]  }
 0x11a   : > { %2352 = vmatprep.mubr.bf16.mxu1 %v430_v31  ;;  %v3822_v31 = vld [vmem:[%s4366_s19 + $0x5e8] sm:$0xff]  }
 0x11b   : > { %3256 = vmatpush3.bf16.msra.mxu0 %v3741_v62  ;;  %v3797_v62 = vld [vmem:[%s4366_s19 + $0x438] sm:$0xff]  }
 0x11c   : > { %3278 = vmatpush3.bf16.msra.mxu1 %v3743_v0  ;;  %3257 = vmatprep.subr.bf16.mxu0 %v3744_v1  ;;  %v407_v0 = vld [vmem:[%s4359_s11 + $0x88] sm:$0xff] }
 0x11d   : > { %3279 = vmatprep.subr.bf16.mxu1 %v3746_v3  ;;  %v432_v1 = vpack.c.bf16 %v407_v0, %v407_v0  ;;  %v406_v3 = vld [vmem:[%s4359_s11 + $0x80] sm:$0xff] }
 0x11f   : > { %3258 = vmatpush3.bf16.msra.mxu0 %v3745_v2  ;;  %v3799_v2 = vld [vmem:[%s4366_s19 + $0x4b8] sm:$0xff]  }
 0x120   : > { %3280 = vmatpush3.bf16.msra.mxu1 %v3747_v4  ;;  %3259 = vmatprep.subr.bf16.mxu0 %v3748_v5  ;;  %v431_v4 = vpack.c.bf16 %v406_v3, %v406_v3  ;;  %v3800_v5 = vld [vmem:[%s4366_s19 + $0x540] sm:$0xff]  }
 0x121   : > { %3281 = vmatprep.subr.bf16.mxu1 %v3750_v7 }
 0x123   : > { %3260 = vmatpush3.bf16.msra.mxu0 %v3749_v6  ;;  %v409_v6 = vld [vmem:[%s4359_s11 + $0x98] sm:$0xff] }
 0x124   : > { %3282 = vmatpush3.bf16.msra.mxu1 %v3751_v8  ;;  %3261 = vmatprep.subr.bf16.mxu0 %v3752_v9  ;;  %v434_v7 = vpack.c.bf16 %v409_v6, %v409_v6  ;;  %v3801_v8 = vld [vmem:[%s4366_s19 + $0x500] sm:$0xff]  }
 0x125   : > { %3283 = vmatprep.subr.bf16.mxu1 %v3754_v11  ;;  %v408_v9 = vld [vmem:[%s4359_s11 + $0x90] sm:$0xff] }
 0x126   : > { %v3802_v11 = vld [vmem:[%s4366_s19 + $0x5c0] sm:$0xff]  }
 0x127   : > { %3262 = vmatpush3.bf16.msra.mxu0 %v3753_v10  ;;  %v433_v10 = vpack.c.bf16 %v408_v9, %v408_v9 }
 0x128   : > { %3284 = vmatpush3.bf16.msra.mxu1 %v3755_v12  ;;  %3263 = vmatprep.subr.bf16.mxu0 %v3756_v13  ;;  %v3803_v12 = vld [vmem:[%s4366_s19 + $0x580] sm:$0xff]   ;;  %v3804_v13 = vld [vmem:[%s4366_s19 + $0x548] sm:$0xff]  }
 0x129   : > { %3285 = vmatprep.subr.bf16.mxu1 %v3758_v15  ;;  %v3806_v15 = vld [vmem:[%s4366_s19 + $0x5c8] sm:$0xff]  }
 0x12b   : > { %3264 = vmatpush3.bf16.msra.mxu0 %v3757_v14  ;;  %v3805_v14 = vld [vmem:[%s4366_s19 + $0x508] sm:$0xff]  }
 0x12c   : > { %3286 = vmatpush3.bf16.msra.mxu1 %v3759_v16  ;;  %3265 = vmatprep.subr.bf16.mxu0 %v3760_v17  ;;  %v3807_v16 = vld [vmem:[%s4366_s19 + $0x588] sm:$0xff]   ;;  %v3808_v17 = vld [vmem:[%s4366_s19 + $0x550] sm:$0xff]  }
 0x12d   : > { %3287 = vmatprep.subr.bf16.mxu1 %v3762_v19  ;;  %v3810_v19 = vld [vmem:[%s4366_s19 + $0x5d0] sm:$0xff]  }
 0x12f   : > { %3266 = vmatpush3.bf16.msra.mxu0 %v3761_v18  ;;  %v3809_v18 = vld [vmem:[%s4366_s19 + $0x510] sm:$0xff]  }
 0x130   : > { %3288 = vmatpush3.bf16.msra.mxu1 %v3763_v20  ;;  %3267 = vmatprep.subr.bf16.mxu0 %v3764_v21  ;;  %v3811_v20 = vld [vmem:[%s4366_s19 + $0x590] sm:$0xff]   ;;  %v3812_v21 = vld [vmem:[%s4366_s19 + $0x558] sm:$0xff]  }
 0x131   : > { %3289 = vmatprep.subr.bf16.mxu1 %v3766_v23  ;;  %v3814_v23 = vld [vmem:[%s4366_s19 + $0x5d8] sm:$0xff]  }
 0x133   : > { %3268 = vmatpush3.bf16.msra.mxu0 %v3765_v22  ;;  %v3813_v22 = vld [vmem:[%s4366_s19 + $0x518] sm:$0xff]  }
 0x134   : > { %3290 = vmatpush3.bf16.msra.mxu1 %v3767_v26  ;;  %3297 = vmatprep.subr.bf16.mxu0 %v3768_v29  ;;  %v3817_v26 = vld [vmem:[%s4366_s19 + $0x520] sm:$0xff]   ;;  %v3820_v29 = vld [vmem:[%s4366_s19 + $0x568] sm:$0xff]  }
 0x135   : > { %3319 = vmatprep.subr.bf16.mxu1 %v3770_v35  ;;  %v3826_v35 = vld [vmem:[%s4366_s19 + $0x5f0] sm:$0xff]  }
 0x136   : > { %2313 = vmatmul.mubr.bf16.vlgmr.msra.gmra.mrb[12].mxu0 %v427_v28  ;;  %v3819_v28 = vld [vmem:[%s4366_s19 + $0x5a0] sm:$0xff]  }
 0x137   : > { %3298 = vmatpush3.bf16.msra.mxu0 %v3769_v32  ;;  %2353 = vmatmul.mubr.bf16.vlgmr.msra.gmra.mrb[12].mxu1 %v429_v34  ;;  %v3823_v32 = vld [vmem:[%s4366_s19 + $0x5a8] sm:$0xff]   ;;  %v3825_v34 = vld [vmem:[%s4366_s19 + $0x530] sm:$0xff]  }
 0x138   : > { %3320 = vmatpush3.bf16.msra.mxu1 %v3771_v36  ;;  %3299 = vmatprep.subr.bf16.mxu0 %v3772_v37  ;;  %v3827_v36 = vld [vmem:[%s4366_s19 + $0x5b0] sm:$0xff]   ;;  %v3828_v37 = vld [vmem:[%s4366_s19 + $0x578] sm:$0xff]  }
 0x139   : > { %3321 = vmatprep.subr.bf16.mxu1 %v3774_v39  ;;  %2392 = vmatprep.mubr.bf16.mxu0 %v432_v1  ;;  %v3830_v39 = vld [vmem:[%s4366_s19 + $0x5f8] sm:$0xff]  }
 0x13a   : > { %2432 = vmatprep.mubr.bf16.mxu1 %v434_v7 }
 0x13b   : > { %3300 = vmatpush3.bf16.msra.mxu0 %v3773_v38  ;;  %v3829_v38 = vld [vmem:[%s4366_s19 + $0x538] sm:$0xff]  }
 0x13c   : > { %3322 = vmatpush3.bf16.msra.mxu1 %v3775_v40  ;;  %3301 = vmatprep.subr.bf16.mxu0 %v3776_v41  ;;  %v411_v40 = vld [vmem:[%s4359_s11 + $0xa8] sm:$0xff] }
 0x13d   : > { %3323 = vmatprep.subr.bf16.mxu1 %v3778_v43  ;;  %v436_v41 = vpack.c.bf16 %v411_v40, %v411_v40  ;;  %v410_v43 = vld [vmem:[%s4359_s11 + $0xa0] sm:$0xff] }
 0x13f   : > { %3302 = vmatpush3.bf16.msra.mxu0 %v3777_v42  ;;  %v3831_v42 = vld [vmem:[%s4366_s19 + $0x5b8] sm:$0xff]  }
 0x140   : > { %3324 = vmatpush3.bf16.msra.mxu1 %v3779_v44  ;;  %3303 = vmatprep.subr.bf16.mxu0 %v3780_v45  ;;  %v4090_v44 = vmov 0.0   ;;  %v413_v45 = vld [vmem:[%s4359_s11 + $0xb8] sm:$0xff] }
 0x141   : > { %3325 = vmatprep.subr.bf16.mxu1 %v3782_v47  ;;  %v438_v47 = vpack.c.bf16 %v413_v45, %v413_v45 }
 0x143   : > { %3304 = vmatpush3.bf16.msra.mxu0 %v3781_v46  ;;  %v435_v46 = vpack.c.bf16 %v410_v43, %v410_v43 }
 0x144   : > { %3326 = vmatpush3.bf16.msra.mxu1 %v3783_v48  ;;  %3305 = vmatprep.subr.bf16.mxu0 %v3784_v49  ;;  %v3832_v48 = vld [vmem:[%s4366_s19 + $0x600] sm:$0xff]  }
 0x145   : > { %3327 = vmatprep.subr.bf16.mxu1 %v3786_v51  ;;  %v412_v49 = vld [vmem:[%s4359_s11 + $0xb0] sm:$0xff] }
 0x146   : > { %v3833_v51 = vld [vmem:[%s4366_s19 + $0x608] sm:$0xff]  }
 0x147   : > { %3306 = vmatpush3.bf16.msra.mxu0 %v3785_v50  ;;  %v437_v50 = vpack.c.bf16 %v412_v49, %v412_v49 }
 0x148   : > { %3328 = vmatpush3.bf16.msra.mxu1 %v3787_v52  ;;  %3307 = vmatprep.subr.bf16.mxu0 %v3788_v53  ;;  %v3834_v52 = vld [vmem:[%s4366_s19 + $0x610] sm:$0xff]   ;;  %v3835_v53 = vld [vmem:[%s4366_s19 + $0x618] sm:$0xff]  }
 0x149   : > { %3329 = vmatprep.subr.bf16.mxu1 %v3790_v55  ;;  %v3837_v55 = vld [vmem:[%s4366_s19 + $0x628] sm:$0xff]  }
 0x14b   : > { %3308 = vmatpush3.bf16.msra.mxu0 %v3789_v54  ;;  %v3836_v54 = vld [vmem:[%s4366_s19 + $0x620] sm:$0xff]  }
 0x14c   : > { %3330 = vmatpush3.bf16.msra.mxu1 %v3791_v56  ;;  %3309 = vmatprep.subr.bf16.mxu0 %v3792_v57  ;;  %v3838_v56 = vld [vmem:[%s4366_s19 + $0x630] sm:$0xff]   ;;  %v3839_v57 = vld [vmem:[%s4366_s19 + $0x638] sm:$0xff]  }
 0x14d   : > { %3331 = vmatprep.subr.bf16.mxu1 %v3794_v59 }
 0x14f   : > { %3310 = vmatpush3.bf16.msra.mxu0 %v3793_v58  ;;  %v414_v58 = vld [vmem:[%s4359_s11 + $0xc0] sm:$0xff] }
 0x150   : > { %3332 = vmatpush3.bf16.msra.mxu1 %v3795_v60  ;;  %3311 = vmatprep.subr.bf16.mxu0 %v3796_v61  ;;  %v439_v59 = vpack.c.bf16 %v414_v58, %v414_v58 }
 0x151   : > { %3333 = vmatprep.subr.bf16.mxu1 %v3798_v63 }
 0x153   : > { %3312 = vmatpush3.bf16.msra.mxu0 %v3797_v62 }
 0x154   : > { %3334 = vmatpush3.bf16.msra.mxu1 %v3799_v2  ;;  %3341 = vmatprep.subr.bf16.mxu0 %v3800_v5 }
 0x155   : > { %3363 = vmatprep.subr.bf16.mxu1 %v3802_v11 }
 0x156   : > { %2393 = vmatmul.mubr.bf16.vlgmr.msra.gmra.mrb[16].mxu0 %v431_v4 }
 0x157   : > { %3342 = vmatpush3.bf16.msra.mxu0 %v3801_v8  ;;  %2433 = vmatmul.mubr.bf16.vlgmr.msra.gmra.mrb[16].mxu1 %v433_v10 }
 0x158   : > { %3364 = vmatpush3.bf16.msra.mxu1 %v3803_v12  ;;  %3343 = vmatprep.subr.bf16.mxu0 %v3804_v13 }
 0x159   : > { %3365 = vmatprep.subr.bf16.mxu1 %v3806_v15  ;;  %2472 = vmatprep.mubr.bf16.mxu0 %v436_v41 }
 0x15a   : > { %2512 = vmatprep.mubr.bf16.mxu1 %v438_v47 }
 0x15b   : > { %3344 = vmatpush3.bf16.msra.mxu0 %v3805_v14 }
 0x15c   : > { %3366 = vmatpush3.bf16.msra.mxu1 %v3807_v16  ;;  %3345 = vmatprep.subr.bf16.mxu0 %v3808_v17 }
 0x15d   : > { %3367 = vmatprep.subr.bf16.mxu1 %v3810_v19 }
 0x15f   : > { %3346 = vmatpush3.bf16.msra.mxu0 %v3809_v18 }
 0x160   : > { %3368 = vmatpush3.bf16.msra.mxu1 %v3811_v20  ;;  %3347 = vmatprep.subr.bf16.mxu0 %v3812_v21 }
 0x161   : > { %3369 = vmatprep.subr.bf16.mxu1 %v3814_v23 }
 0x163   : > { %3348 = vmatpush3.bf16.msra.mxu0 %v3813_v22 }
 0x164   : > { %3370 = vmatpush3.bf16.msra.mxu1 %v3815_v24  ;;  %3349 = vmatprep.subr.bf16.mxu0 %v3816_v25 }
 0x165   : > { %3371 = vmatprep.subr.bf16.mxu1 %v3818_v27 }
 0x167   : > { %3350 = vmatpush3.bf16.msra.mxu0 %v3817_v26 }
 0x168   : > { %3372 = vmatpush3.bf16.msra.mxu1 %v3819_v28  ;;  %3351 = vmatprep.subr.bf16.mxu0 %v3820_v29 }
 0x169   : > { %3373 = vmatprep.subr.bf16.mxu1 %v3822_v31 }
 0x16b   : > { %3352 = vmatpush3.bf16.msra.mxu0 %v3821_v30 }
 0x16c   : > { %3374 = vmatpush3.bf16.msra.mxu1 %v3823_v32  ;;  %3353 = vmatprep.subr.bf16.mxu0 %v3824_v33 }
 0x16d   : > { %3375 = vmatprep.subr.bf16.mxu1 %v3826_v35 }
 0x16f   : > { %3354 = vmatpush3.bf16.msra.mxu0 %v3825_v34 }
 0x170   : > { %3376 = vmatpush3.bf16.msra.mxu1 %v3827_v36  ;;  %3355 = vmatprep.subr.bf16.mxu0 %v3828_v37 }
 0x171   : > { %3377 = vmatprep.subr.bf16.mxu1 %v3830_v39 }
 0x173   : > { %3356 = vmatpush3.bf16.msra.mxu0 %v3829_v38 }
 0x174   : > { %3420 = vmatprep.subr.bf16.mxu0 %v4090_v44  ;;  %3378 = vmatpush3.bf16.msra.mxu1 %v3831_v42 }
 0x176   : > { %2473 = vmatmul.mubr.bf16.vlgmr.msra.gmra.mrb[20].mxu0 %v435_v46 }
 0x177   : > { %3421 = vmatpush3.bf16.msra.mxu0 %v3832_v48  ;;  %2513 = vmatmul.mubr.bf16.vlgmr.msra.gmra.mrb[20].mxu1 %v437_v50 }
 0x178   : > { %3422 = vmatprep.subr.bf16.mxu0 %v4090_v44  ;;  %3436 = vmatprep.mubr.msk.bf16.mxu0 %vm4091_vm0, %v4090_v44 }
 0x17b   : > { %3423 = vmatpush3.bf16.msra.mxu0 %v3833_v51 }
 0x17c   : > { %3424 = vmatprep.subr.bf16.mxu0 %v4090_v44 }
 0x17f   : > { %3425 = vmatpush3.bf16.msra.mxu0 %v3834_v52 }
 0x180   : > { %3426 = vmatprep.subr.bf16.mxu0 %v4090_v44 }
 0x183   : > { %3427 = vmatpush3.bf16.msra.mxu0 %v3835_v53 }
 0x184   : > { %3428 = vmatprep.subr.bf16.mxu0 %v4090_v44 }
 0x187   : > { %3429 = vmatpush3.bf16.msra.mxu0 %v3836_v54 }
 0x188   : > { %3430 = vmatprep.subr.bf16.mxu0 %v4090_v44 }
 0x18b   : > { %3431 = vmatpush3.bf16.msra.mxu0 %v3837_v55 }
 0x18c   : > { %3432 = vmatprep.subr.bf16.mxu0 %v4090_v44 }
 0x18f   : > { %3433 = vmatpush3.bf16.msra.mxu0 %v3838_v56 }
 0x190   : > { %3434 = vmatprep.subr.bf16.mxu0 %v4090_v44 }
 0x193   : > { %3435 = vmatpush3.bf16.msra.mxu0 %v3839_v57 }
 0x196   : > { %3437 = vmatmul.mubr.bf16.vlgmr.msra.gmra.mrb[24].mxu0 %v439_v59 }
 0x1a9   : > { %v3137_v60 = vpop.f32.mrb[0].mxu0 }
 0x1aa   : > { %v3159_v61 = vpop.f32.mrb[0].mxu1  ;;  %v3138_v62 = vpop.f32.mrb[1].mxu0 }
 0x1ab   : > { %v3160_v63 = vpop.f32.mrb[1].mxu1  ;;  %v3139_v0 = vadd.f32 %v3138_v62, %v3137_v60  ;;  %v3140_v2 = vpop.f32.mrb[2].mxu0 }
 0x1ac   : > { %v3161_v1 = vadd.f32 %v3160_v63, %v3159_v61  ;;  %v3162_v3 = vpop.f32.mrb[2].mxu1  ;;  %v3141_v4 = vpop.f32.mrb[3].mxu0 }
 0x1ad   : > { %v3163_v5 = vpop.f32.mrb[3].mxu1  ;;  %v389_v3 = vld [vmem:[#allocation2] sm:$0xff] }
 0x1ae   : > { %v2115_v6 = vadd.f32 %v3161_v1, %v3139_v0 }
 0x1c9   : > { %v3181_v7 = vpop.f32.mrb[4].mxu0 }
 0x1ca   : > { %v3182_v8 = vpop.f32.mrb[5].mxu0  ;;  %v3203_v11 = vpop.f32.mrb[4].mxu1 }
 0x1cb   : > { %v3183_v9 = vadd.f32 %v3182_v8, %v3181_v7  ;;  %v3184_v10 = vpop.f32.mrb[6].mxu0  ;;  %v3204_v13 = vpop.f32.mrb[5].mxu1 }
 0x1cc   : > { %v3185_v12 = vpop.f32.mrb[7].mxu0  ;;  %v3205_v15 = vadd.f32 %v3204_v13, %v3203_v11  ;;  %v3206_v16 = vpop.f32.mrb[6].mxu1  ;;  %v2576_v10 = vld [vmem:[%s4726_s3] sm:$0xff] (!%p3110_p13)  ;;  %v2577_v11 = vld [vmem:[%s4726_s3 + $0x8] sm:$0xff] (!%p3110_p13)  ;;  %v4092_v13 = vmov (!%p3110_p13), 0.0|0.0  }
 0x1cd   : > { %v2155_v14 = vadd.f32 %v3183_v9, %v2115_v6  ;;  %v3207_v17 = vpop.f32.mrb[7].mxu1  ;;  %v2578_v12 = vld [vmem:[%s4726_s3 + $0x10] sm:$0xff] (!%p3110_p13)  ;;  %3494 = vmatprep.subr.bf16.mxu0 (!%p3110_p13), %v4092_v13  ;;  %v4094_v16 = vmov (!%p3110_p13), 0.0   ;;  %3518 = vmatprep.subr.bf16.mxu1 (!%p3110_p13), %v4092_v13 }
 0x1ce   : > { %3472 = vmatprep.mubr.msk.f32.mxu0 (!%p3110_p13), %vm4093_vm1, %v4094_v16  ;;  %3491 = vmatprep.mubr.msk.f32.mxu1 (!%p3110_p13), %vm4093_vm1, %v4094_v16 }
 0x1cf   : > { %v2195_v18 = vadd.f32 %v3205_v15, %v2155_v14  ;;  %v3495_v14 = vpack.c.bf16 (!%p3110_p13), %v2577_v11, %v2576_v10  ;;  %v2579_v15 = vld [vmem:[%s4726_s3 + $0x18] sm:$0xff] (!%p3110_p13) }
 0x1d0   : > { %v3498_v17 = vpack.c.bf16 (!%p3110_p13), %v2579_v15, %v2578_v12 }
 0x1d1   : > { %3496 = vmatpush3.bf16.msra.mxu0 (!%p3110_p13), %v3495_v14 }
 0x1d2   : > { %3497 = vmatprep.subr.bf16.mxu0 (!%p3110_p13), %v4092_v13 }
 0x1d5   : > { %3499 = vmatpush3.bf16.msra.mxu0 (!%p3110_p13), %v3498_v17 }
 0x1d6   : > { %3500 = vmatprep.subr.bf16.mxu0 (!%p3110_p13), %v4092_v13 }
 0x1e9   : > { %v3225_v19 = vpop.f32.mrb[8].mxu0 }
 0x1ea   : > { %v3226_v20 = vpop.f32.mrb[9].mxu0  ;;  %v3247_v23 = vpop.f32.mrb[8].mxu1 }
 0x1eb   : > { %v3227_v21 = vadd.f32 %v3226_v20, %v3225_v19  ;;  %v3228_v22 = vpop.f32.mrb[10].mxu0  ;;  %v3248_v25 = vpop.f32.mrb[9].mxu1  ;;  %v2581_v19 = vld [vmem:[%s4726_s3 + $0x28] sm:$0xff] (!%p3110_p13)  ;;  %v2670_v20 = vld [vmem:[%s4728_s5] sm:$0xff] (!%p3110_p13) }
 0x1ec   : > { %v3229_v24 = vpop.f32.mrb[11].mxu0  ;;  %v3249_v27 = vadd.f32 %v3248_v25, %v3247_v23  ;;  %v3250_v28 = vpop.f32.mrb[10].mxu1  ;;  %v2672_v22 = vld [vmem:[%s4728_s5 + $0x10] sm:$0xff] (!%p3110_p13)  ;;  %v2673_v25 = vld [vmem:[%s4728_s5 + $0x18] sm:$0xff] (!%p3110_p13) }
 0x1ed   : > { %v2235_v26 = vadd.f32 %v3227_v21, %v2195_v18  ;;  %v3251_v29 = vpop.f32.mrb[11].mxu1  ;;  %v2580_v18 = vld [vmem:[%s4726_s3 + $0x20] sm:$0xff] (!%p3110_p13)  ;;  %v2671_v21 = vld [vmem:[%s4728_s5 + $0x8] sm:$0xff] (!%p3110_p13)  ;;  %v3522_v28 = vpack.c.bf16 (!%p3110_p13), %v2673_v25, %v2672_v22 }
 0x1ee   : > { %v3501_v23 = vpack.c.bf16 (!%p3110_p13), %v2581_v19, %v2580_v18  ;;  %v3519_v24 = vpack.c.bf16 (!%p3110_p13), %v2671_v21, %v2670_v20  ;;  %v2674_v29 = vld [vmem:[%s4728_s5 + $0x20] sm:$0xff] (!%p3110_p13) }
 0x1ef   : > { %v2275_v30 = vadd.f32 %v3249_v27, %v2235_v26  ;;  %v2582_v26 = vld [vmem:[%s4726_s3 + $0x30] sm:$0xff] (!%p3110_p13)  ;;  %v2583_v27 = vld [vmem:[%s4726_s3 + $0x38] sm:$0xff] (!%p3110_p13) }
 0x1f0   : > { %3520 = vmatpush3.bf16.msra.mxu1 (!%p3110_p13), %v3519_v24  ;;  %3502 = vmatpush3.bf16.msra.mxu0 (!%p3110_p13), %v3501_v23 }
 0x1f1   : > { %3521 = vmatprep.subr.bf16.mxu1 (!%p3110_p13), %v4092_v13  ;;  %3503 = vmatprep.subr.bf16.mxu0 (!%p3110_p13), %v4092_v13 }
 0x1f4   : > { %3523 = vmatpush3.bf16.msra.mxu1 (!%p3110_p13), %v3522_v28 }
 0x1f5   : > { %3524 = vmatprep.subr.bf16.mxu1 (!%p3110_p13), %v4092_v13 }
 0x209   : > { %v3269_v31 = vpop.f32.mrb[12].mxu0 }
 0x20a   : > { %v3270_v32 = vpop.f32.mrb[13].mxu0  ;;  %v3291_v35 = vpop.f32.mrb[12].mxu1 }
 0x20b   : > { %v3271_v33 = vadd.f32 %v3270_v32, %v3269_v31  ;;  %v3272_v34 = vpop.f32.mrb[14].mxu0  ;;  %v3292_v38 = vpop.f32.mrb[13].mxu1  ;;  %v3504_v31 = vpack.c.bf16 (!%p3110_p13), %v2583_v27, %v2582_v26  ;;  %v2584_v32 = vld [vmem:[%s4726_s3 + $0x40] sm:$0xff] (!%p3110_p13) }
 0x20c   : > { %v3273_v36 = vpop.f32.mrb[15].mxu0  ;;  %v3293_v39 = vadd.f32 %v3292_v38, %v3291_v35  ;;  %v3294_v40 = vpop.f32.mrb[14].mxu1 }
 0x20d   : > { %v2315_v37 = vadd.f32 %v3271_v33, %v2275_v30  ;;  %v3295_v41 = vpop.f32.mrb[15].mxu1  ;;  %v2675_v30 = vld [vmem:[%s4728_s5 + $0x28] sm:$0xff] (!%p3110_p13)  ;;  %3505 = vmatpush3.bf16.msra.mxu0 (!%p3110_p13), %v3504_v31  ;;  %v2586_v36 = vld [vmem:[%s4726_s3 + $0x50] sm:$0xff] (!%p3110_p13) }
 0x20e   : > { %v2585_v33 = vld [vmem:[%s4726_s3 + $0x48] sm:$0xff] (!%p3110_p13)  ;;  %v3525_v34 = vpack.c.bf16 (!%p3110_p13), %v2675_v30, %v2674_v29  ;;  %3506 = vmatprep.subr.bf16.mxu0 (!%p3110_p13), %v4092_v13 }
 0x20f   : > { %v2355_v42 = vadd.f32 %v3293_v39, %v2315_v37  ;;  %v3507_v35 = vpack.c.bf16 (!%p3110_p13), %v2585_v33, %v2584_v32  ;;  %v2587_v37 = vld [vmem:[%s4726_s3 + $0x58] sm:$0xff] (!%p3110_p13)  ;;  %v2588_v39 = vld [vmem:[%s4726_s3 + $0x60] sm:$0xff] (!%p3110_p13)  ;;  %v2589_v40 = vld [vmem:[%s4726_s3 + $0x68] sm:$0xff] (!%p3110_p13) }
 0x210   : > { %3526 = vmatpush3.bf16.msra.mxu1 (!%p3110_p13), %v3525_v34  ;;  %v3510_v38 = vpack.c.bf16 (!%p3110_p13), %v2587_v37, %v2586_v36  ;;  %v3513_v41 = vpack.c.bf16 (!%p3110_p13), %v2589_v40, %v2588_v39 }
 0x211   : > { %3527 = vmatprep.subr.bf16.mxu1 (!%p3110_p13), %v4092_v13  ;;  %3508 = vmatpush3.bf16.msra.mxu0 (!%p3110_p13), %v3507_v35 }
 0x212   : > { %3509 = vmatprep.subr.bf16.mxu0 (!%p3110_p13), %v4092_v13 }
 0x215   : > { %3511 = vmatpush3.bf16.msra.mxu0 (!%p3110_p13), %v3510_v38 }
 0x216   : > { %3512 = vmatprep.subr.bf16.mxu0 (!%p3110_p13), %v4092_v13 }
 0x219   : > { %3514 = vmatpush3.bf16.msra.mxu0 (!%p3110_p13), %v3513_v41 }
 0x21a   : > { %3515 = vmatprep.subr.bf16.mxu0 (!%p3110_p13), %v4092_v13 }
 0x229   : > { %v3313_v43 = vpop.f32.mrb[16].mxu0 }
 0x22a   : > { %v3314_v44 = vpop.f32.mrb[17].mxu0  ;;  %v3335_v47 = vpop.f32.mrb[16].mxu1 }
 0x22b   : > { %v3315_v45 = vadd.f32 %v3314_v44, %v3313_v43  ;;  %v3316_v46 = vpop.f32.mrb[18].mxu0  ;;  %v3336_v50 = vpop.f32.mrb[17].mxu1  ;;  %v3111_v43 = vld [vmem:[#allocation8] ss:$0 sm:$0xff] (!%p3110_p13)  ;;  %v2590_v44 = vld [vmem:[%s4726_s3 + $0x70] sm:$0xff] (!%p3110_p13) }
 0x22c   : > { %v3317_v48 = vpop.f32.mrb[19].mxu0  ;;  %v3337_v51 = vadd.f32 %v3336_v50, %v3335_v47  ;;  %v3338_v52 = vpop.f32.mrb[18].mxu1  ;;  %v2677_v50 = vld [vmem:[%s4728_s5 + $0x38] sm:$0xff] (!%p3110_p13) }
 0x22d   : > { %v2395_v49 = vadd.f32 %v3315_v45, %v2355_v42  ;;  %v3339_v53 = vpop.f32.mrb[19].mxu1  ;;  %v2591_v45 = vld [vmem:[%s4726_s3 + $0x78] sm:$0xff] (!%p3110_p13) }
 0x22e   : > { %v3516_v47 = vpack.c.bf16 (!%p3110_p13), %v2591_v45, %v2590_v44  ;;  %v3112_v52 = vld [vmem:[#allocation9] ss:$0 sm:$0xff] (!%p3110_p13) }
 0x22f   : > { %v2435_v54 = vadd.f32 %v3337_v51, %v2395_v49  ;;  %v2676_v49 = vld [vmem:[%s4728_s5 + $0x30] sm:$0xff] (!%p3110_p13) }
 0x230   : > { %3517 = vmatpush3.bf16.msra.mxu0 (!%p3110_p13), %v3516_v47  ;;  %v3528_v51 = vpack.c.bf16 (!%p3110_p13), %v2677_v50, %v2676_v49 }
 0x232   : > { %3529 = vmatpush3.bf16.msra.mxu1 (!%p3110_p13), %v3528_v51 }
 0x249   : > { %v3357_v55 = vpop.f32.mrb[20].mxu0 }
 0x24a   : > { %v3358_v56 = vpop.f32.mrb[21].mxu0  ;;  %v3379_v57 = vpop.f32.mrb[20].mxu1 }
 0x24b   : > { %v3359_v58 = vadd.f32 %v3358_v56, %v3357_v55  ;;  %v3360_v59 = vpop.f32.mrb[22].mxu0  ;;  %v3380_v60 = vpop.f32.mrb[21].mxu1 }
 0x24c   : > { %v3361_v61 = vpop.f32.mrb[23].mxu0  ;;  %v3381_v62 = vadd.f32 %v3380_v60, %v3379_v57  ;;  %v3382_v63 = vpop.f32.mrb[22].mxu1  ;;  %v3113_v57 = vld [vmem:[#allocation11] ss:$0 sm:$0xff] (!%p3110_p13) }
 0x24d   : > { %v2475_v0 = vadd.f32 %v3359_v58, %v2435_v54  ;;  %v3383_v1 = vpop.f32.mrb[23].mxu1 }
 0x24f   : > { %v2515_v2 = vadd.f32 %v3381_v62, %v2475_v0 }
 0x268   : > { %2565 = sbr.rel (%p3110_p13) target bundleno = 1381 (0x565), region = 76 }
 0x269   : > { %v2554_v4 = vpop.f32.mrb[24].mxu0 }
 0x26a   : > { %v2555_v5 = vadd.f32 %v2554_v4, %v2515_v2  ;;  %v3438_v6 = vpop.f32.mrb[25].mxu0 }
 0x26b   : > { %v2557_v7 = vpop.f32.mrb[26].mxu0 }
 0x26c   : > { %v2560_v8 = vadd.f32 %v2555_v5, %v389_v3  ;;  %v3439_v9 = vpop.f32.mrb[27].mxu0 }
 0x26e   : > { %2561 = vst [vmem:[#allocation2] sm:$0xff] %v2560_v8 }
 0x275   : > { %v2566_v42 = vld [vmem:[#allocation2] sm:$0xff] }
 0x276   : > { %v2574_v46 = vadd.f32 %v3111_v43, %v2566_v42 }
 0x278   : > { %v2575_v48 = vmax.f32 %v2574_v46, 0.0 }
 0x27a   : > { %3473 = vmatmul.mubr.f32.vlgmr.msra.gmra.mrb[0].mxu0 %v2575_v48 }
 0x34d   : > { %v2665_v53 = vpop.f32.mrb[0].mxu0 }
 0x34e   : > { %v2666_v54 = vadd.f32 %v3112_v52, %v2665_v53  ;;  %v3474_v55 = vpop.f32.mrb[1].mxu0 }
 0x350   : > { %v2669_v56 = vmax.f32 %v2666_v54, 0.0 }
 0x352   : > { %3492 = vmatmul.mubr.msk.f32.vlgmr.msra.gmra.mrb[0].mxu1 %vm2685_vm2, %v2669_v56 }
 0x425   : > { %v2755_v58 = vpop.f32.mrb[0].mxu1 }
 0x426   : > { %v2756_v59 = vadd.f32 %v3113_v57, %v2755_v58  ;;  %v3493_v60 = vpop.f32.mrb[1].mxu1 }
 0x428   : > { %v2760_v61 = vsel %vm2759_vm3, %v2756_v59, -inf }
 0x429   : > { %2761 = vmax.xlane.f32.xlu0 %v2760_v61 }
 0x4b6   : > { %v2762_v62 = vpop.xlane.xlu0 %2761 }
 0x4b7   : > { %v2763_v63 = vsub.f32 %v2756_v59, %v2762_v62 }
 0x4b9   : > { %v2764_v0 = vmul.f32 1.442695, %v2763_v63 }
 0x4bb   : > { %3840 = vpow2.f32 %v2764_v0 }
 0x4c5   : > { %v3841_v1 = vpop.eup %3840 }
 0x4c6   : > { %v2766_v2 = vsel %vm2759_vm3, %v3841_v1, 0.0 }
 0x4c7   : > { %2767 = vadd.xlane.f32.xlu0 %v2766_v2 }
 0x554   : > { %v2768_v3 = vpop.xlane.xlu0 %2767 }
 0x555   : > { %3842 = vlog2.f32 %v2768_v3 }
 0x55f   : > { %v3843_v4 = vpop.eup %3842 }
 0x560   : > { %v2770_v5 = vmul.f32 0.6931472, %v3843_v4 }
 0x562   : > { %v2771_v6 = vsub.f32 %v2763_v63, %v2770_v5 }
 0x564   : > { %2772 = vst.msk [vmem:[#allocation12] sm:$0xff] %vm2759_vm3, %v2771_v6 }
 0x565 PF: > { %p3578_p2 = scmp.eq.s32.totalorder %s4165_s30, 4  ;;  %s4095_s0 = smov [#allocation12]  }
 0x566   : > { %s2782_s11 = sshll.u32 %s4095_s0, 4  ;;  %s2783_s11 = int_to_ptr.vmem [resolvable:$true] %s2782_s11 }
 0x567   : > { %s3988_s12 = scalar_lea.vmem %s2783_s11, 128  ;;  %p3995_p8 = scmp.lt.s32.totalorder %s2783_s11, %s2783_s11 }
 0x568   : > { %p3989_p3 = scmp.ne.s32.totalorder %s2783_s11, %s3988_s12  ;;  %p3996_p10 = scmp.lt.s32.totalorder %s3988_s12, %s3988_s12 }
 0x56a   : > { %p3990_p0 = pnand %p3989_p3, %p3578_p2  ;;  %p3997_p12 = por %p3996_p10, %p3995_p8 }
 0x56c   : > { %p3991_p6 = pneg %p3990_p0 }
 0x56e   : > { %p3998_p9 = pnand %p3997_p12, %p3991_p6 }
 0x570   : > { %4001 = shalt.err (!%p3998_p9)
}
 0x571   : > { %s4002_s19 = scalar_lea.hbm %s4730_s7, 128 }
 0x572   : > { %p4003_p11 = scmp.ne.s32.totalorder %s4730_s7, %s4002_s19  ;;  %p4008_p5 = scmp.lt.u32.totalorder %s4002_s19, %s4730_s7 }
 0x574   : > { %p4004_p1 = pnand %p4003_p11, %p3578_p2 }
 0x576   : > { %p4005_p4 = pneg %p4004_p1 }
 0x578   : > { %p4010_p7 = pnand %p4008_p5, %p4005_p4 }
 0x57a   : > { %4013 = shalt.err (!%p4010_p7)
}
 0x57b   : > { %3551 = dma.vmem_to_hbm [thread:$0]  (%p3578_p2), %s2783_s11, 128, %s4730_s7, [#allocation5]  }
 0x57c   : > { %4055 = dma.done.wait (%p3578_p2), [#allocation5], 128  }
 0x57d   : > { %4057 = vsyncadd (%p3578_p2), [#allocation5], 4294967168 }
 0x57e PF: > { %s25_s29 = sadd.s32 1, %s4080_s29   ;;  %s4749_s24 = smov %s4064_s25 }
 0x57f   : > { %p22_p13 = scmp.ge.s32.totalorder %s25_s29, 7   ;;  %s4750_s25 = smov %s4068_s26 }
 0x580   : > { %s4751_s26 = smov %s4285_s21  ;;  %s4752_s27 = smov %s4076_s28 }
 0x581   : > { %s4753_s28 = smov %s4755_s17  ;;  %24 = sbr.rel (!%p22_p13) target bundleno = 11 (0xb), region = 119 }
 0x588   :  { %2795 = vsyncpa [#allocation4], 1 }
 0x589   :  { %2797 = vsyncpa [#allocation4 + $0x1], 1 }
 0x58a   :  { %2798 = vsyncpa [#allocation7], 1 }
 0x58b   :  { %2800 = vsyncpa [#allocation7 + $0x1], 1 }
 0x58c   :  { %2801 = vsyncpa [#allocation10], 1 }
 0x58d   :  { %2802 = vsyncpa [#allocation5], 1 }
 0x58e   :  { %2804 = vsyncpa [#allocation5 + $0x1], 1 }

</bundles_post_ra>
